<compile_context>
chip_gen: v6e
topology: v6e:2x2x1
jax: 0.10.0
libtpu: 0.0.40
codegen_flags: <defaults>
</compile_context>

<pallas_src>
import jax
import jax.numpy as jnp
from jax.experimental import pallas as pl
from jax.experimental.pallas import tpu as pltpu


# ----------------------- wrapper-side weight repacking ---------------------- #

def _band_conv3x3(w_hwio, W):
    """(3,3,Cin,Cout) HWIO conv weight -> (3, W*Cin, W*Cout) banded weights.

    For each kernel row dy, B[dy] implements the width dimension of a SAME 3x3
    conv as one matmul on a lane-packed row (length W*Cin):
        out[u*Cout+co] = sum_{v,ci} row[v*Cin+ci] * B[dy, v*Cin+ci, u*Cout+co]
    with B[dy, v*Cin+ci, u*Cout+co] = w[dy, v-u+1, ci, co] when 0 <= v-u+1 < 3.
    Out-of-range taps are absent, so zero W-padding is implicit.
    """
    kh, kw, cin, cout = w_hwio.shape
    v = jnp.arange(W)[:, None, None]
    u = jnp.arange(W)[None, :, None]
    dx = jnp.arange(kw)[None, None, :]
    sel = (v - u + 1 == dx).astype(w_hwio.dtype)                # (W, W, 3)
    band = jnp.einsum("vux,yxio->yviuo", sel, w_hwio)           # (3, W, Cin, W, Cout)
    return band.reshape(kh, W * cin, W * cout)


def _band_conv1x1(wd, W):
    """(Cin,Cout) 1x1 conv weight -> block-diagonal (W*Cin, W*Cout)."""
    cin, cout = wd.shape
    eye = jnp.eye(W, dtype=wd.dtype)
    return jnp.einsum("vu,io->viuo", eye, wd).reshape(W * cin, W * cout)


# --------------------------------- kernel ----------------------------------- #

def _make_kernel(has_downsample, *, eps, N, H, W, Cin, Cout):
    WCin, WCout = W * Cin, W * Cout
    R = N * H                       # interior rows (row index = h*N + n)
    Rpad = (H + 2) * N              # padded rows (shared zero halo rows)
    inv_cnt = 1.0 / float(N * H * W)

    def body(x_ref, bnp_ref, B1_ref, B2_ref, Bd_ref, out_ref, xpad_ref, y1pad_ref):
        # Lane->lane "per-channel mean broadcast" matrix, built once from iota:
        # P[l, l'] = 1/(N*H*W) if (l % Cout) == (l' % Cout) else 0.
        # One M=1 matmul with P yields the channel mean already broadcast back
        # to the packed-lane layout (no separate gather + broadcast matmuls).
        li = jax.lax.broadcasted_iota(jnp.int32, (WCout, WCout), 0)
        lj = jax.lax.broadcasted_iota(jnp.int32, (WCout, WCout), 1)
        P = jnp.where((li % Cout) == (lj % Cout),
                      jnp.float32(inv_cnt), jnp.float32(0.0))

        def bn(y, g_row, b_row):
            # Training-mode BN, centered two-pass (avoids E[x^2]-E[x]^2
            # cancellation), all f32.  gamma/beta rows are already lane-tiled.
            gamma_l = bnp_ref[g_row:g_row + 1, :]               # (1, W*Cout)
            beta_l = bnp_ref[b_row:b_row + 1, :]
            s1 = jnp.sum(y, axis=0, keepdims=True)              # (1, W*Cout)
            mean_l = jnp.dot(s1, P, preferred_element_type=jnp.float32)
            d = y - mean_l
            s2 = jnp.sum(d * d, axis=0, keepdims=True)
            var_l = jnp.dot(s2, P, preferred_element_type=jnp.float32)
            scale_l = gamma_l * jax.lax.rsqrt(var_l + eps)
            return d * scale_l + beta_l

        def conv3x3(pad_ref, band_ref):
            # 3 MXU pushes with K = W*Ci; dy windows read from the padded ref
            # (sublane offset folds into the vld), dy=0 initializes acc.
            acc = jnp.dot(pad_ref[0:R, :], band_ref[0],
                          preferred_element_type=jnp.float32)
            for dy in (1, 2):
                acc = acc + jnp.dot(pad_ref[dy * N:dy * N + R, :], band_ref[dy],
                                    preferred_element_type=jnp.float32)
            return acc

        # ---- stage the bf16 input with its 2 shared zero halo rows ----
        zin = jnp.zeros((N, WCin), jnp.bfloat16)
        xpad_ref[0:N, :] = zin
        xpad_ref[R + N:Rpad, :] = zin
        xpad_ref[N:N + R, :] = x_ref[...].astype(jnp.bfloat16)

        # ---- conv1 -> bn1 -> relu ----
        y1 = jnp.maximum(bn(conv3x3(xpad_ref, B1_ref), 0, 1), 0.0)

        # ---- stage y1 (bf16) with halo rows for conv2 ----
        zout = jnp.zeros((N, WCout), jnp.bfloat16)
        y1pad_ref[0:N, :] = zout
        y1pad_ref[R + N:Rpad, :] = zout
        y1pad_ref[N:N + R, :] = y1.astype(jnp.bfloat16)

        # ---- conv2 -> bn2 ----
        y2 = bn(conv3x3(y1pad_ref, B2_ref), 2, 3)

        # ---- identity path ----
        if has_downsample:
            ident = jnp.dot(xpad_ref[N:N + R, :], Bd_ref[...],
                            preferred_element_type=jnp.float32)
            ident = bn(ident, 4, 5)
        else:
            ident = x_ref[...]                                   # WCin == WCout, f32

        # ---- residual add + relu; lane-dense (W*Cout) store ----
        # (could store bf16 / keep NHWC-packed downstream to halve output HBM
        #  traffic if the consumer tolerates it)
        out_ref[...] = jnp.maximum(y2 + ident, 0.0).astype(out_ref.dtype)

    if has_downsample:
        def kernel(x, bnp, B1, B2, Bd, out, xpad, y1pad):
            body(x, bnp, B1, B2, Bd, out, xpad, y1pad)
    else:
        def kernel(x, bnp, B1, B2, out, xpad, y1pad):
            body(x, bnp, B1, B2, None, out, xpad, y1pad)
    return kernel


# --------------------------------- wrapper ----------------------------------- #

def residual_block(x_nchw, params, eps=1e-5):
    """Pallas residual block. x_nchw: (N, Cin, H, W); returns (N, Cout, H, W)."""
    N, Cin, H, W = x_nchw.shape
    Cout = params["w1"].shape[-1]
    has_ds = Cin != Cout
    R = N * H

    # Row-packed layout: row index = h*N + n (so one shared zero halo row-pair
    # serves every image), lane index = w*C + c.  Input passed once, f32.
    x_rows = jnp.transpose(x_nchw.astype(jnp.float32),
                           (2, 0, 3, 1)).reshape(R, W * Cin)

    B1 = _band_conv3x3(jnp.asarray(params["w1"], jnp.float32), W).astype(jnp.bfloat16)
    B2 = _band_conv3x3(jnp.asarray(params["w2"], jnp.float32), W).astype(jnp.bfloat16)

    # All six gamma/beta rows, pre-tiled to the packed-lane layout, in ONE array.
    def tile_row(v):
        return jnp.tile(jnp.asarray(v, jnp.float32).reshape(1, -1), (1, W))

    bn_rows = [params["g1"], params["b1"], params["g2"], params["b2"]]
    if has_ds:
        bn_rows += [params["gd"], params["bd"]]
    bnp = jnp.zeros((8, W * Cout), jnp.float32)
    for i, v in enumerate(bn_rows):
        bnp = bnp.at[i:i + 1, :].set(tile_row(v))

    args = [x_rows, bnp, B1, B2]
    if has_ds:
        Bd = _band_conv1x1(jnp.asarray(params["wd"], jnp.float32), W)
        args.append(Bd.astype(jnp.bfloat16))

    kernel = _make_kernel(has_ds, eps=eps, N=N, H=H, W=W, Cin=Cin, Cout=Cout)

    out = pl.pallas_call(
        kernel,
        out_shape=jax.ShapeDtypeStruct((R, W * Cout), jnp.float32),
        in_specs=[pl.BlockSpec(memory_space=pltpu.MemorySpace.VMEM)] * len(args),
        out_specs=pl.BlockSpec(memory_space=pltpu.MemorySpace.VMEM),
        scratch_shapes=[
            pltpu.VMEM(((H + 2) * N, W * Cin), jnp.bfloat16),    # padded x
            pltpu.VMEM(((H + 2) * N, W * Cout), jnp.bfloat16),   # padded y1
        ],
    )(*args)

    out = out.reshape(H, N, W, Cout)
    return jnp.transpose(out, (1, 3, 0, 2))                      # -> NCHW


# ------------------------- pure-JAX reference ------------------------------- #

def ref_residual_block(x_nchw, params, eps=1e-5):
    x = jnp.transpose(x_nchw, (0, 2, 3, 1)).astype(jnp.float32)

    def conv3(a, w):
        return jax.lax.conv_general_dilated(
            a, w, (1, 1), "SAME",
            dimension_numbers=("NHWC", "HWIO", "NHWC"))

    def bn(y, g, b):
        m = jnp.mean(y, axis=(0, 1, 2))
        v = jnp.mean((y - m) ** 2, axis=(0, 1, 2))
        return (y - m) * jax.lax.rsqrt(v + eps) * g + b

    Cin = x.shape[-1]
    Cout = params["w1"].shape[-1]
    y = jax.nn.relu(bn(conv3(x, params["w1"]), params["g1"], params["b1"]))
    y = bn(conv3(y, params["w2"]), params["g2"], params["b2"])
    if Cin != Cout:
        ident = jnp.einsum("nhwc,cd->nhwd", x, params["wd"])
        ident = bn(ident, params["gd"], params["bd"])
    else:
        ident = x
    out = jax.nn.relu(y + ident)
    return jnp.transpose(out, (0, 3, 1, 2))


# ---------------------------------- main ------------------------------------ #

if __name__ == "__main__":
    key = jax.random.PRNGKey(0)
    N, Cin, H, W = 2, 4, 16, 16
    Cout = 8  # in_channels != out_channels -> downsample path exercised

    kx, k1, k2, k3, kg = jax.random.split(key, 5)
    x = jax.random.normal(kx, (N, Cin, H, W), jnp.float32)

    # PyTorch Conv2d weight layout is (Cout, Cin, kh, kw); convert to HWIO.
    w1_t = jax.random.normal(k1, (Cout, Cin, 3, 3), jnp.float32) * 0.1
    w2_t = jax.random.normal(k2, (Cout, Cout, 3, 3), jnp.float32) * 0.1
    wd_t = jax.random.normal(k3, (Cout, Cin, 1, 1), jnp.float32) * 0.1
    g1, g2, gd, b1, b2, bd = jax.random.normal(kg, (6, Cout), jnp.float32) * 0.1 + 1.0

    params = dict(
        w1=jnp.transpose(w1_t, (2, 3, 1, 0)),          # (3,3,Cin,Cout)
        w2=jnp.transpose(w2_t, (2, 3, 1, 0)),          # (3,3,Cout,Cout)
        wd=jnp.transpose(wd_t, (2, 3, 1, 0))[0, 0],    # (Cin,Cout)
        g1=g1, b1=b1 - 1.0,
        g2=g2, b2=b2 - 1.0,
        gd=gd, bd=bd - 1.0,
    )

    out = jax.block_until_ready(residual_block(x, params))
    ref = ref_residual_block(x, params)
    assert out.shape == (N, Cout, H, W), out.shape
    assert bool(jnp.all(jnp.isfinite(out)))
    assert bool(jnp.allclose(out, ref, atol=5e-2, rtol=5e-2)), (
        float(jnp.max(jnp.abs(out - ref))))

    # Also exercise the identity (no-downsample) path: Cin == Cout.
    k5, k6 = jax.random.split(kg)
    x2 = jax.random.normal(k5, (N, Cout, H, W), jnp.float32)
    w1_sq = jax.random.normal(k6, (3, 3, Cout, Cout), jnp.float32) * 0.1
    params2 = dict(w1=w1_sq, w2=params["w2"],
                   g1=params["g1"], b1=params["b1"],
                   g2=params["g2"], b2=params["b2"])
    out2 = jax.block_until_ready(residual_block(x2, params2))
    ref2 = ref_residual_block(x2, params2)
    assert bool(jnp.allclose(out2, ref2, atol=5e-2, rtol=5e-2)), (
        float(jnp.max(jnp.abs(out2 - ref2))))

    print("KERNEL_OK")
</pallas_src>

<mosaic_0001>
module attributes {stable_mosaic.version = 11 : i64} {
  func.func @kernel(%arg0: memref<32x64xf32, #tpu.memory_space<vmem>>, %arg1: memref<8x128xf32, #tpu.memory_space<vmem>>, %arg2: memref<3x64x128xbf16, #tpu.memory_space<vmem>>, %arg3: memref<3x128x128xbf16, #tpu.memory_space<vmem>>, %arg4: memref<64x128xbf16, #tpu.memory_space<vmem>>, %arg5: memref<32x128xf32, #tpu.memory_space<vmem>>, %arg6: memref<36x64xbf16, #tpu.memory_space<vmem>>, %arg7: memref<36x128xbf16, #tpu.memory_space<vmem>>) attributes {dimension_semantics = [], scalar_prefetch = 0 : i64, scratch_operands = 2 : i64, tpu.core_type = #tpu.core_type<tc>} {
    %0 = tpu.iota {dimensions = array<i32: 0>} : vector<128x128xi32>
    %1 = tpu.iota {dimensions = array<i32: 1>} : vector<128x128xi32>
    %c8_i32 = arith.constant 8 : i32
    %c0_i32 = arith.constant 0 : i32
    %2 = arith.cmpi eq, %c8_i32, %c0_i32 : i32
    %c1_i32 = arith.constant 1 : i32
    %3 = arith.select %2, %c1_i32, %c8_i32 : i32
    %4 = vector.broadcast %3 : i32 to vector<128x128xi32>
    %5 = arith.remsi %0, %4 : vector<128x128xi32>
    %c0_i32_0 = arith.constant 0 : i32
    %6 = vector.broadcast %c0_i32_0 : i32 to vector<128x128xi32>
    %7 = arith.cmpi ne, %5, %6 : vector<128x128xi32>
    %c0_i32_1 = arith.constant 0 : i32
    %8 = vector.broadcast %c0_i32_1 : i32 to vector<128x128xi32>
    %9 = arith.cmpi slt, %5, %8 : vector<128x128xi32>
    %c0_i32_2 = arith.constant 0 : i32
    %10 = arith.cmpi slt, %3, %c0_i32_2 : i32
    %11 = vector.broadcast %10 : i1 to vector<128x128xi1>
    %12 = vector.broadcast %11 : vector<128x128xi1> to vector<128x128xi1>
    %13 = arith.xori %9, %12 : vector<128x128xi1>
    %14 = arith.andi %13, %7 : vector<128x128xi1>
    %15 = vector.broadcast %3 : i32 to vector<128x128xi32>
    %16 = arith.addi %5, %15 : vector<128x128xi32>
    %17 = arith.select %14, %16, %5 : vector<128x128xi1>, vector<128x128xi32>
    %c8_i32_3 = arith.constant 8 : i32
    %c0_i32_4 = arith.constant 0 : i32
    %18 = arith.cmpi eq, %c8_i32_3, %c0_i32_4 : i32
    %c1_i32_5 = arith.constant 1 : i32
    %19 = arith.select %18, %c1_i32_5, %c8_i32_3 : i32
    %20 = vector.broadcast %19 : i32 to vector<128x128xi32>
    %21 = arith.remsi %1, %20 : vector<128x128xi32>
    %c0_i32_6 = arith.constant 0 : i32
    %22 = vector.broadcast %c0_i32_6 : i32 to vector<128x128xi32>
    %23 = arith.cmpi ne, %21, %22 : vector<128x128xi32>
    %c0_i32_7 = arith.constant 0 : i32
    %24 = vector.broadcast %c0_i32_7 : i32 to vector<128x128xi32>
    %25 = arith.cmpi slt, %21, %24 : vector<128x128xi32>
    %c0_i32_8 = arith.constant 0 : i32
    %26 = arith.cmpi slt, %19, %c0_i32_8 : i32
    %27 = vector.broadcast %26 : i1 to vector<128x128xi1>
    %28 = vector.broadcast %27 : vector<128x128xi1> to vector<128x128xi1>
    %29 = arith.xori %25, %28 : vector<128x128xi1>
    %30 = arith.andi %29, %23 : vector<128x128xi1>
    %31 = vector.broadcast %19 : i32 to vector<128x128xi32>
    %32 = arith.addi %21, %31 : vector<128x128xi32>
    %33 = arith.select %30, %32, %21 : vector<128x128xi1>, vector<128x128xi32>
    %34 = arith.cmpi eq, %17, %33 : vector<128x128xi32>
    %cst = arith.constant 0.001953125 : f32
    %cst_9 = arith.constant 0.000000e+00 : f32
    %35 = vector.broadcast %cst : f32 to vector<128x128xf32>
    %36 = vector.broadcast %cst_9 : f32 to vector<128x128xf32>
    %37 = arith.select %34, %35, %36 : vector<128x128xi1>, vector<128x128xf32>
    %cst_10 = arith.constant 0.000000e+00 : bf16
    %38 = vector.broadcast %cst_10 : bf16 to vector<2x64xbf16>
    %c0 = arith.constant 0 : index
    %c0_11 = arith.constant 0 : index
    %39 = vector.load %arg6[%c0, %c0_11] : memref<36x64xbf16, #tpu.memory_space<vmem>>, vector<2x64xbf16>
    tpu.vector_store %arg6[%c0, %c0_11], %38 {strides = array<i32>} : memref<36x64xbf16, #tpu.memory_space<vmem>>, vector<2x64xbf16>,
    %c34 = arith.constant 34 : index
    %c0_12 = arith.constant 0 : index
    %40 = vector.load %arg6[%c34, %c0_12] : memref<36x64xbf16, #tpu.memory_space<vmem>>, vector<2x64xbf16>
    tpu.vector_store %arg6[%c34, %c0_12], %38 {strides = array<i32>} : memref<36x64xbf16, #tpu.memory_space<vmem>>, vector<2x64xbf16>,
    %c0_13 = arith.constant 0 : index
    %c0_14 = arith.constant 0 : index
    %41 = vector.load %arg0[%c0_13, %c0_14] : memref<32x64xf32, #tpu.memory_space<vmem>>, vector<32x64xf32>
    %42 = arith.truncf %41 : vector<32x64xf32> to vector<32x64xbf16>
    %c2 = arith.constant 2 : index
    %c0_15 = arith.constant 0 : index
    %43 = vector.load %arg6[%c2, %c0_15] : memref<36x64xbf16, #tpu.memory_space<vmem>>, vector<32x64xbf16>
    tpu.vector_store %arg6[%c2, %c0_15], %42 {strides = array<i32>} : memref<36x64xbf16, #tpu.memory_space<vmem>>, vector<32x64xbf16>,
    %c0_16 = arith.constant 0 : index
    %c0_17 = arith.constant 0 : index
    %44 = vector.load %arg6[%c0_16, %c0_17] : memref<36x64xbf16, #tpu.memory_space<vmem>>, vector<32x64xbf16>
    %c0_18 = arith.constant 0 : index
    %c0_19 = arith.constant 0 : index
    %c0_20 = arith.constant 0 : index
    %45 = vector.load %arg2[%c0_18, %c0_19, %c0_20] : memref<3x64x128xbf16, #tpu.memory_space<vmem>>, vector<1x64x128xbf16>
    %46 = vector.shape_cast %45 : vector<1x64x128xbf16> to vector<64x128xbf16>
    %cst_21 = arith.constant dense<0.000000e+00> : vector<32x128xf32>
    %47 = tpu.matmul %44, %46, %cst_21 {dimension_numbers = #tpu.dot_dimension_numbers<[1], [0], [0], [1], [0, 0, 1, 1], [], []>} : vector<32x64xbf16>, vector<64x128xbf16>, vector<32x128xf32> -> vector<32x128xf32>
    %c2_22 = arith.constant 2 : index
    %c0_23 = arith.constant 0 : index
    %48 = vector.load %arg6[%c2_22, %c0_23] : memref<36x64xbf16, #tpu.memory_space<vmem>>, vector<32x64xbf16>
    %c1 = arith.constant 1 : index
    %c0_24 = arith.constant 0 : index
    %c0_25 = arith.constant 0 : index
    %49 = vector.load %arg2[%c1, %c0_24, %c0_25] : memref<3x64x128xbf16, #tpu.memory_space<vmem>>, vector<1x64x128xbf16>
    %50 = vector.shape_cast %49 : vector<1x64x128xbf16> to vector<64x128xbf16>
    %cst_26 = arith.constant dense<0.000000e+00> : vector<32x128xf32>
    %51 = tpu.matmul %48, %50, %cst_26 {dimension_numbers = #tpu.dot_dimension_numbers<[1], [0], [0], [1], [0, 0, 1, 1], [], []>} : vector<32x64xbf16>, vector<64x128xbf16>, vector<32x128xf32> -> vector<32x128xf32>
    %52 = arith.addf %47, %51 : vector<32x128xf32>
    %c4 = arith.constant 4 : index
    %c0_27 = arith.constant 0 : index
    %53 = vector.load %arg6[%c4, %c0_27] : memref<36x64xbf16, #tpu.memory_space<vmem>>, vector<32x64xbf16>
    %c2_28 = arith.constant 2 : index
    %c0_29 = arith.constant 0 : index
    %c0_30 = arith.constant 0 : index
    %54 = vector.load %arg2[%c2_28, %c0_29, %c0_30] : memref<3x64x128xbf16, #tpu.memory_space<vmem>>, vector<1x64x128xbf16>
    %55 = vector.shape_cast %54 : vector<1x64x128xbf16> to vector<64x128xbf16>
    %cst_31 = arith.constant dense<0.000000e+00> : vector<32x128xf32>
    %56 = tpu.matmul %53, %55, %cst_31 {dimension_numbers = #tpu.dot_dimension_numbers<[1], [0], [0], [1], [0, 0, 1, 1], [], []>} : vector<32x64xbf16>, vector<64x128xbf16>, vector<32x128xf32> -> vector<32x128xf32>
    %57 = arith.addf %52, %56 : vector<32x128xf32>
    %c0_32 = arith.constant 0 : index
    %c0_33 = arith.constant 0 : index
    %58 = vector.load %arg1[%c0_32, %c0_33] : memref<8x128xf32, #tpu.memory_space<vmem>>, vector<1x128xf32>
    %c1_34 = arith.constant 1 : index
    %c0_35 = arith.constant 0 : index
    %59 = vector.load %arg1[%c1_34, %c0_35] : memref<8x128xf32, #tpu.memory_space<vmem>>, vector<1x128xf32>
    %cst_36 = arith.constant dense<0.000000e+00> : vector<128xf32>
    %60 = vector.multi_reduction <add>, %57, %cst_36 [0] : vector<32x128xf32> to vector<128xf32>
    %61 = vector.shape_cast %60 : vector<128xf32> to vector<1x128xf32>
    %cst_37 = arith.constant dense<0.000000e+00> : vector<1x128xf32>
    %62 = tpu.matmul %61, %37, %cst_37 {dimension_numbers = #tpu.dot_dimension_numbers<[1], [0], [0], [1], [0, 0, 1, 1], [], []>} : vector<1x128xf32>, vector<128x128xf32>, vector<1x128xf32> -> vector<1x128xf32>
    %63 = vector.broadcast %62 : vector<1x128xf32> to vector<32x128xf32>
    %64 = arith.subf %57, %63 : vector<32x128xf32>
    %65 = arith.mulf %64, %64 : vector<32x128xf32>
    %cst_38 = arith.constant dense<0.000000e+00> : vector<128xf32>
    %66 = vector.multi_reduction <add>, %65, %cst_38 [0] : vector<32x128xf32> to vector<128xf32>
    %67 = vector.shape_cast %66 : vector<128xf32> to vector<1x128xf32>
    %cst_39 = arith.constant dense<0.000000e+00> : vector<1x128xf32>
    %68 = tpu.matmul %67, %37, %cst_39 {dimension_numbers = #tpu.dot_dimension_numbers<[1], [0], [0], [1], [0, 0, 1, 1], [], []>} : vector<1x128xf32>, vector<128x128xf32>, vector<1x128xf32> -> vector<1x128xf32>
    %cst_40 = arith.constant 9.99999974E-6 : f32
    %69 = vector.broadcast %cst_40 : f32 to vector<1x128xf32>
    %70 = arith.addf %68, %69 : vector<1x128xf32>
    %71 = math.rsqrt %70 : vector<1x128xf32>
    %72 = arith.mulf %58, %71 : vector<1x128xf32>
    %73 = vector.broadcast %72 : vector<1x128xf32> to vector<32x128xf32>
    %74 = arith.mulf %64, %73 : vector<32x128xf32>
    %75 = vector.broadcast %59 : vector<1x128xf32> to vector<32x128xf32>
    %76 = arith.addf %74, %75 : vector<32x128xf32>
    %cst_41 = arith.constant 0.000000e+00 : f32
    %77 = vector.broadcast %cst_41 : f32 to vector<32x128xf32>
    %78 = arith.maximumf %76, %77 : vector<32x128xf32>
    %cst_42 = arith.constant 0.000000e+00 : bf16
    %79 = vector.broadcast %cst_42 : bf16 to vector<2x128xbf16>
    %c0_43 = arith.constant 0 : index
    %c0_44 = arith.constant 0 : index
    %80 = vector.load %arg7[%c0_43, %c0_44] : memref<36x128xbf16, #tpu.memory_space<vmem>>, vector<2x128xbf16>
    tpu.vector_store %arg7[%c0_43, %c0_44], %79 {strides = array<i32>} : memref<36x128xbf16, #tpu.memory_space<vmem>>, vector<2x128xbf16>,
    %c34_45 = arith.constant 34 : index
    %c0_46 = arith.constant 0 : index
    %81 = vector.load %arg7[%c34_45, %c0_46] : memref<36x128xbf16, #tpu.memory_space<vmem>>, vector<2x128xbf16>
    tpu.vector_store %arg7[%c34_45, %c0_46], %79 {strides = array<i32>} : memref<36x128xbf16, #tpu.memory_space<vmem>>, vector<2x128xbf16>,
    %82 = arith.truncf %78 : vector<32x128xf32> to vector<32x128xbf16>
    %c2_47 = arith.constant 2 : index
    %c0_48 = arith.constant 0 : index
    %83 = vector.load %arg7[%c2_47, %c0_48] : memref<36x128xbf16, #tpu.memory_space<vmem>>, vector<32x128xbf16>
    tpu.vector_store %arg7[%c2_47, %c0_48], %82 {strides = array<i32>} : memref<36x128xbf16, #tpu.memory_space<vmem>>, vector<32x128xbf16>,
    %c0_49 = arith.constant 0 : index
    %c0_50 = arith.constant 0 : index
    %84 = vector.load %arg7[%c0_49, %c0_50] : memref<36x128xbf16, #tpu.memory_space<vmem>>, vector<32x128xbf16>
    %c0_51 = arith.constant 0 : index
    %c0_52 = arith.constant 0 : index
    %c0_53 = arith.constant 0 : index
    %85 = vector.load %arg3[%c0_51, %c0_52, %c0_53] : memref<3x128x128xbf16, #tpu.memory_space<vmem>>, vector<1x128x128xbf16>
    %86 = vector.shape_cast %85 : vector<1x128x128xbf16> to vector<128x128xbf16>
    %cst_54 = arith.constant dense<0.000000e+00> : vector<32x128xf32>
    %87 = tpu.matmul %84, %86, %cst_54 {dimension_numbers = #tpu.dot_dimension_numbers<[1], [0], [0], [1], [0, 0, 1, 1], [], []>} : vector<32x128xbf16>, vector<128x128xbf16>, vector<32x128xf32> -> vector<32x128xf32>
    %c2_55 = arith.constant 2 : index
    %c0_56 = arith.constant 0 : index
    %88 = vector.load %arg7[%c2_55, %c0_56] : memref<36x128xbf16, #tpu.memory_space<vmem>>, vector<32x128xbf16>
    %c1_57 = arith.constant 1 : index
    %c0_58 = arith.constant 0 : index
    %c0_59 = arith.constant 0 : index
    %89 = vector.load %arg3[%c1_57, %c0_58, %c0_59] : memref<3x128x128xbf16, #tpu.memory_space<vmem>>, vector<1x128x128xbf16>
    %90 = vector.shape_cast %89 : vector<1x128x128xbf16> to vector<128x128xbf16>
    %cst_60 = arith.constant dense<0.000000e+00> : vector<32x128xf32>
    %91 = tpu.matmul %88, %90, %cst_60 {dimension_numbers = #tpu.dot_dimension_numbers<[1], [0], [0], [1], [0, 0, 1, 1], [], []>} : vector<32x128xbf16>, vector<128x128xbf16>, vector<32x128xf32> -> vector<32x128xf32>
    %92 = arith.addf %87, %91 : vector<32x128xf32>
    %c4_61 = arith.constant 4 : index
    %c0_62 = arith.constant 0 : index
    %93 = vector.load %arg7[%c4_61, %c0_62] : memref<36x128xbf16, #tpu.memory_space<vmem>>, vector<32x128xbf16>
    %c2_63 = arith.constant 2 : index
    %c0_64 = arith.constant 0 : index
    %c0_65 = arith.constant 0 : index
    %94 = vector.load %arg3[%c2_63, %c0_64, %c0_65] : memref<3x128x128xbf16, #tpu.memory_space<vmem>>, vector<1x128x128xbf16>
    %95 = vector.shape_cast %94 : vector<1x128x128xbf16> to vector<128x128xbf16>
    %cst_66 = arith.constant dense<0.000000e+00> : vector<32x128xf32>
    %96 = tpu.matmul %93, %95, %cst_66 {dimension_numbers = #tpu.dot_dimension_numbers<[1], [0], [0], [1], [0, 0, 1, 1], [], []>} : vector<32x128xbf16>, vector<128x128xbf16>, vector<32x128xf32> -> vector<32x128xf32>
    %97 = arith.addf %92, %96 : vector<32x128xf32>
    %c2_67 = arith.constant 2 : index
    %c0_68 = arith.constant 0 : index
    %98 = vector.load %arg1[%c2_67, %c0_68] : memref<8x128xf32, #tpu.memory_space<vmem>>, vector<1x128xf32>
    %c3 = arith.constant 3 : index
    %c0_69 = arith.constant 0 : index
    %99 = vector.load %arg1[%c3, %c0_69] : memref<8x128xf32, #tpu.memory_space<vmem>>, vector<1x128xf32>
    %cst_70 = arith.constant dense<0.000000e+00> : vector<128xf32>
    %100 = vector.multi_reduction <add>, %97, %cst_70 [0] : vector<32x128xf32> to vector<128xf32>
    %101 = vector.shape_cast %100 : vector<128xf32> to vector<1x128xf32>
    %cst_71 = arith.constant dense<0.000000e+00> : vector<1x128xf32>
    %102 = tpu.matmul %101, %37, %cst_71 {dimension_numbers = #tpu.dot_dimension_numbers<[1], [0], [0], [1], [0, 0, 1, 1], [], []>} : vector<1x128xf32>, vector<128x128xf32>, vector<1x128xf32> -> vector<1x128xf32>
    %103 = vector.broadcast %102 : vector<1x128xf32> to vector<32x128xf32>
    %104 = arith.subf %97, %103 : vector<32x128xf32>
    %105 = arith.mulf %104, %104 : vector<32x128xf32>
    %cst_72 = arith.constant dense<0.000000e+00> : vector<128xf32>
    %106 = vector.multi_reduction <add>, %105, %cst_72 [0] : vector<32x128xf32> to vector<128xf32>
    %107 = vector.shape_cast %106 : vector<128xf32> to vector<1x128xf32>
    %cst_73 = arith.constant dense<0.000000e+00> : vector<1x128xf32>
    %108 = tpu.matmul %107, %37, %cst_73 {dimension_numbers = #tpu.dot_dimension_numbers<[1], [0], [0], [1], [0, 0, 1, 1], [], []>} : vector<1x128xf32>, vector<128x128xf32>, vector<1x128xf32> -> vector<1x128xf32>
    %cst_74 = arith.constant 9.99999974E-6 : f32
    %109 = vector.broadcast %cst_74 : f32 to vector<1x128xf32>
    %110 = arith.addf %108, %109 : vector<1x128xf32>
    %111 = math.rsqrt %110 : vector<1x128xf32>
    %112 = arith.mulf %98, %111 : vector<1x128xf32>
    %113 = vector.broadcast %112 : vector<1x128xf32> to vector<32x128xf32>
    %114 = arith.mulf %104, %113 : vector<32x128xf32>
    %115 = vector.broadcast %99 : vector<1x128xf32> to vector<32x128xf32>
    %116 = arith.addf %114, %115 : vector<32x128xf32>
    %c2_75 = arith.constant 2 : index
    %c0_76 = arith.constant 0 : index
    %117 = vector.load %arg6[%c2_75, %c0_76] : memref<36x64xbf16, #tpu.memory_space<vmem>>, vector<32x64xbf16>
    %c0_77 = arith.constant 0 : index
    %c0_78 = arith.constant 0 : index
    %118 = vector.load %arg4[%c0_77, %c0_78] : memref<64x128xbf16, #tpu.memory_space<vmem>>, vector<64x128xbf16>
    %cst_79 = arith.constant dense<0.000000e+00> : vector<32x128xf32>
    %119 = tpu.matmul %117, %118, %cst_79 {dimension_numbers = #tpu.dot_dimension_numbers<[1], [0], [0], [1], [0, 0, 1, 1], [], []>} : vector<32x64xbf16>, vector<64x128xbf16>, vector<32x128xf32> -> vector<32x128xf32>
    %c4_80 = arith.constant 4 : index
    %c0_81 = arith.constant 0 : index
    %120 = vector.load %arg1[%c4_80, %c0_81] : memref<8x128xf32, #tpu.memory_space<vmem>>, vector<1x128xf32>
    %c5 = arith.constant 5 : index
    %c0_82 = arith.constant 0 : index
    %121 = vector.load %arg1[%c5, %c0_82] : memref<8x128xf32, #tpu.memory_space<vmem>>, vector<1x128xf32>
    %cst_83 = arith.constant dense<0.000000e+00> : vector<128xf32>
    %122 = vector.multi_reduction <add>, %119, %cst_83 [0] : vector<32x128xf32> to vector<128xf32>
    %123 = vector.shape_cast %122 : vector<128xf32> to vector<1x128xf32>
    %cst_84 = arith.constant dense<0.000000e+00> : vector<1x128xf32>
    %124 = tpu.matmul %123, %37, %cst_84 {dimension_numbers = #tpu.dot_dimension_numbers<[1], [0], [0], [1], [0, 0, 1, 1], [], []>} : vector<1x128xf32>, vector<128x128xf32>, vector<1x128xf32> -> vector<1x128xf32>
    %125 = vector.broadcast %124 : vector<1x128xf32> to vector<32x128xf32>
    %126 = arith.subf %119, %125 : vector<32x128xf32>
    %127 = arith.mulf %126, %126 : vector<32x128xf32>
    %cst_85 = arith.constant dense<0.000000e+00> : vector<128xf32>
    %128 = vector.multi_reduction <add>, %127, %cst_85 [0] : vector<32x128xf32> to vector<128xf32>
    %129 = vector.shape_cast %128 : vector<128xf32> to vector<1x128xf32>
    %cst_86 = arith.constant dense<0.000000e+00> : vector<1x128xf32>
    %130 = tpu.matmul %129, %37, %cst_86 {dimension_numbers = #tpu.dot_dimension_numbers<[1], [0], [0], [1], [0, 0, 1, 1], [], []>} : vector<1x128xf32>, vector<128x128xf32>, vector<1x128xf32> -> vector<1x128xf32>
    %cst_87 = arith.constant 9.99999974E-6 : f32
    %131 = vector.broadcast %cst_87 : f32 to vector<1x128xf32>
    %132 = arith.addf %130, %131 : vector<1x128xf32>
    %133 = math.rsqrt %132 : vector<1x128xf32>
    %134 = arith.mulf %120, %133 : vector<1x128xf32>
    %135 = vector.broadcast %134 : vector<1x128xf32> to vector<32x128xf32>
    %136 = arith.mulf %126, %135 : vector<32x128xf32>
    %137 = vector.broadcast %121 : vector<1x128xf32> to vector<32x128xf32>
    %138 = arith.addf %136, %137 : vector<32x128xf32>
    %139 = arith.addf %116, %138 : vector<32x128xf32>
    %cst_88 = arith.constant 0.000000e+00 : f32
    %140 = vector.broadcast %cst_88 : f32 to vector<32x128xf32>
    %141 = arith.maximumf %139, %140 : vector<32x128xf32>
    %c0_89 = arith.constant 0 : index
    %c0_90 = arith.constant 0 : index
    %142 = vector.load %arg5[%c0_89, %c0_90] : memref<32x128xf32, #tpu.memory_space<vmem>>, vector<32x128xf32>
    tpu.vector_store %arg5[%c0_89, %c0_90], %141 {strides = array<i32>} : memref<32x128xf32, #tpu.memory_space<vmem>>, vector<32x128xf32>,
    return
  }
}

</mosaic_0001>

<bundles_post_ra>
// kernel: tpu_custom_call.1
= control target key start
LH: loop header
LB: loop body
LE: loop exit
PB: predicated region body
PF: predicated region fallthrough
CT: control target
= control target key end

     0   :  { %10 = vsyncpa [#allocation5], 0  ;;  %s3380_s0 = inlined_call_operand.hbm [shape: f32[32,64], index: 0, kind: input, shape index: {}]   ;;  %s3381_s1 = inlined_call_operand.hbm [shape: f32[8,128], index: 1, kind: input, shape index: {}]   ;;  %s3382_s2 = inlined_call_operand.hbm [shape: bf16[3,64,128], index: 2, kind: input, shape index: {}]   ;;  %s3383_s3 = inlined_call_operand.hbm [shape: bf16[3,128,128], index: 3, kind: input, shape index: {}]   ;;  %s3384_s4 = inlined_call_operand.hbm [shape: bf16[64,128], index: 4, kind: input, shape index: {}]   ;;  %s3385_s5 = inlined_call_operand.hbm [shape: f32[32,128], index: 5, kind: output, shape index: {}]  }
   0x1   :  { %11 = vsyncpa [#allocation8], 0 }
   0x2   :  { %12 = vsyncpa [#allocation11], 0 }
   0x3   :  { %13 = vsyncpa [#allocation6], 0  ;;  %s2693_s18 = smov [#allocation7]  }
   0x4   :  { %s32_s19 = sshll.u32 %s2693_s18, 4  ;;  %s33_s19 = int_to_ptr.vmem [resolvable:$true] %s32_s19 }
   0x5   :  { %s2573_s20 = scalar_lea.vmem %s33_s19, 128  ;;  %p2578_p1 = scmp.lt.s32.totalorder %s33_s19, %s33_s19 }
   0x6   :  { %p2574_p0 = scmp.ne.s32.totalorder %s33_s19, %s2573_s20  ;;  %p2579_p2 = scmp.lt.s32.totalorder %s2573_s20, %s2573_s20 }
   0x8   :  { %p2580_p3 = por %p2579_p2, %p2578_p1 }
   0xa   :  { %p2581_p4 = pnand %p2580_p3, %p2574_p0 }
   0xc   :  { %2584 = shalt.err (!%p2581_p4)
}
   0xd   :  { %35 = dma.hbm_to_vmem [thread:$0]  %s3381_s1, 128, %s33_s19, [#allocation8]  }
   0xe   :  { %s2694_s23 = smov [#allocation10]   ;;  %s2695_s25 = smov [#allocation4]  }
   0xf   :  { %s53_s24 = sshll.u32 %s2694_s23, 4  ;;  %s19_s26 = sshll.u32 %s2695_s25, 4  ;;  %s54_s24 = int_to_ptr.vmem [resolvable:$true] %s53_s24  ;;  %s20_s26 = int_to_ptr.vmem [resolvable:$true] %s19_s26 }
  0x10   :  { %s2593_s27 = scalar_lea.vmem %s54_s24, 3072  ;;  %p2598_p6 = scmp.lt.s32.totalorder %s54_s24, %s54_s24 }
  0x11   :  { %p2594_p5 = scmp.ne.s32.totalorder %s54_s24, %s2593_s27  ;;  %p2599_p7 = scmp.lt.s32.totalorder %s2593_s27, %s2593_s27 }
  0x13   :  { %p2600_p8 = por %p2599_p7, %p2598_p6 }
  0x15   :  { %p2601_p9 = pnand %p2600_p8, %p2594_p5 }
  0x17   :  { %2604 = shalt.err (!%p2601_p9)
}
  0x18   :  { %s2696_s28 = smov 64   ;;  %s2697_s29 = smov 4  }
  0x19   :  { %59 = dma.hbm_to_vmem [thread:$0]  %s3383_s3, 3072, %s54_s24, [#allocation11], %s2696_s28, %s2696_s28, %s2697_s29  }
  0x1a   :  { %s2613_s1 = scalar_lea.vmem %s20_s26, 512  ;;  %p2618_p11 = scmp.lt.s32.totalorder %s20_s26, %s20_s26 }
  0x1b   :  { %p2614_p10 = scmp.ne.s32.totalorder %s20_s26, %s2613_s1  ;;  %p2619_p12 = scmp.lt.s32.totalorder %s2613_s1, %s2613_s1 }
  0x1d   :  { %p2620_p13 = por %p2619_p12, %p2618_p11 }
  0x1f   :  { %p2621_p0 = pnand %p2620_p13, %p2614_p10 }
  0x21   :  { %2624 = shalt.err (!%p2621_p0)
}
  0x22   :  { %s2698_s7 = smov 128   ;;  %s2699_s8 = smov 8  }
  0x23   :  { %25 = dma.hbm_to_vmem [thread:$0]  %s3380_s0, 512, %s20_s26, [#allocation5], %s2698_s7, %s2698_s7, %s2699_s8  }
  0x24   :  { %s2700_s11 = smov [#allocation9]   ;;  %s2701_s3 = smov [#allocation12]  }
  0x25   :  { %s41_s12 = sshll.u32 %s2700_s11, 4  ;;  %s65_s13 = sshll.u32 %s2701_s3, 4  ;;  %s42_s12 = int_to_ptr.vmem [resolvable:$true] %s41_s12  ;;  %s66_s13 = int_to_ptr.vmem [resolvable:$true] %s65_s13 }
  0x26   :  { %s2633_s14 = scalar_lea.vmem %s42_s12, 1536  ;;  %p2638_p2 = scmp.lt.s32.totalorder %s42_s12, %s42_s12 }
  0x27   :  { %p2634_p1 = scmp.ne.s32.totalorder %s42_s12, %s2633_s14  ;;  %p2639_p3 = scmp.lt.s32.totalorder %s2633_s14, %s2633_s14 }
  0x29   :  { %p2640_p4 = por %p2639_p3, %p2638_p2 }
  0x2b   :  { %p2641_p5 = pnand %p2640_p4, %p2634_p1 }
  0x2d   :  { %2644 = shalt.err (!%p2641_p5)
}
  0x2e   :  { %47 = dma.hbm_to_vmem [thread:$0]  %s3382_s2, 1536, %s42_s12, [#allocation8], %s2696_s28, %s2696_s28, %s2697_s29  }
  0x2f   :  { %s2653_s0 = scalar_lea.vmem %s66_s13, 512  ;;  %p2658_p7 = scmp.lt.s32.totalorder %s66_s13, %s66_s13 }
  0x30   :  { %p2654_p6 = scmp.ne.s32.totalorder %s66_s13, %s2653_s0  ;;  %p2659_p8 = scmp.lt.s32.totalorder %s2653_s0, %s2653_s0 }
  0x32   :  { %p2660_p9 = por %p2659_p8, %p2658_p7 }
  0x34   :  { %p2661_p10 = pnand %p2660_p9, %p2654_p6 }
  0x36   :  { %2664 = shalt.err (!%p2661_p10)
}
  0x37   :  { %71 = dma.hbm_to_vmem [thread:$0]  %s3384_s4, 512, %s66_s13, [#allocation11], %s2696_s28, %s2696_s28, %s2697_s29  }
  0x38   :  { %2685 = dma.done.wait [#allocation5], 512  }
  0x39   :  { %2686 = vsyncadd [#allocation5], 4294966784 }
  0x3a   :  { %2687 = dma.done.wait [#allocation8], 1664  }
  0x3b   :  { %2688 = vsyncadd [#allocation8], 4294965632 }
  0x3c   :  { %2689 = dma.done.wait [#allocation11], 3584  }
  0x3d   :  { %2690 = vsyncadd [#allocation11], 4294963712  ;;  %vm343_vm0 = vcmask 516096   ;;  %v2702_v0 = vmov 0   ;;  %v2506_v1 = vld [vmem:[#allocation9 + $0x38] sm:$0xff]   ;;  %v2508_v3 = vld [vmem:[#allocation9 + $0x30] sm:$0xff]   ;;  %v88_v53 = vlaneseq }
  0x3e   :  { %344 = vst.msk [vmem:[#allocation2] sm:$0x1] %vm343_vm0, %v2702_v0  ;;  %893 = vst [vmem:[#allocation3] sm:$0x1] %v2702_v0  ;;  %v2507_v2 = vld [vmem:[#allocation9 + $0x18] sm:$0xff]   ;;  %2174 = vmatprep.subr.bf16.mxu0 %v2506_v1  ;;  %v2509_v4 = vld [vmem:[#allocation9 + $0x10] sm:$0xff]  }
  0x3f   :  { %2175 = vmatpush3.bf16.msra.mxu0 %v2506_v1  ;;  %2186 = vmatprep.subr.bf16.mxu1 %v2507_v2  ;;  %v2510_v5 = vld [vmem:[#allocation9 + $0x28] sm:$0xff]   ;;  %v2512_v7 = vld [vmem:[#allocation9 + $0x20] sm:$0xff]   ;;  %v347_v9 = vld [vmem:[#allocation4] sm:$0xff]  ;;  %vm363_vm1 = vcmask 1040384   ;;  %vm364_vm2 = vcmask 1044484   ;;  %vm382_vm3 = vcmask 519169  }
  0x40   :  { %2187 = vmatpush3.bf16.msra.mxu1 %v2507_v2  ;;  %2176 = vmatprep.subr.bf16.mxu0 %v2508_v3  ;;  %v2511_v6 = vld [vmem:[#allocation9 + $0x8] sm:$0xff]   ;;  %v2513_v8 = vld [vmem:[#allocation9] sm:$0xff]   ;;  %v350_v12 = vld [vmem:[#allocation4 + $0x18] sm:$0xff]  ;;  %v2010_v13 = vpack.c.bf16 %v347_v9, %v347_v9  ;;  %vm384_vm5 = vcmask 519168   ;;  %vm3386_vm6 = vcmask 523264   ;;  %vm3388_vm7 = vcmask 1046528  }
  0x41   :  { %2188 = vmatprep.subr.bf16.mxu1 %v2509_v4  ;;  %v348_v10 = vld [vmem:[#allocation4 + $0x8] sm:$0xff]  ;;  %v349_v11 = vld [vmem:[#allocation4 + $0x10] sm:$0xff]  ;;  %v2013_v16 = vpack.c.bf16 %v350_v12, %v350_v12  ;;  %vm2765_vm4 = vmor %vm363_vm1, %vm364_vm2  ;;  %vm3387_vm8 = vcmask 1045504   ;;  %v2786_v54 = vshrl.u32 %v88_v53, 7  ;;  %v106_v56 = vand.u32 127, %v88_v53  ;;  %s2706_s2 = smov [#allocation13]  }
  0x42   :  { %v2011_v14 = vpack.c.bf16 %v348_v10, %v348_v10  ;;  %v2012_v15 = vpack.c.bf16 %v349_v11, %v349_v11  ;;  %v366_v18 = vrot.slane %v2010_v13, 7  ;;  %v2516_v22 = vld [vmem:[#allocation9 + $0x58] sm:$0xff]   ;;  %v2518_v43 = vld [vmem:[#allocation9 + $0x50] sm:$0xff]   ;;  %v2519_v48 = vld [vmem:[#allocation9 + $0x48] sm:$0xff]   ;;  %v2703_v57 = vmov 0.0   ;;  %s1826_s4 = sshll.u32 %s2706_s2, 4  ;;  %s1827_s4 = int_to_ptr.vmem [resolvable:$true] %s1826_s4 }
  0x43   :  { %2177 = vmatpush3.bf16.msra.mxu0 %v2508_v3  ;;  %v374_v21 = vrot.slane %v2013_v16, 7  ;;  %v2520_v50 = vld [vmem:[#allocation9 + $0x40] sm:$0xff]   ;;  %v104_v55 = vadd.s32 120, %v2786_v54  ;;  %v103_v58 = vadd.s32 112, %v2786_v54  ;;  %v2792_v60 = vand.u32 7, %v106_v56  ;;  %s2665_s19 = scalar_lea.vmem %s1827_s4, 512  ;;  %p2670_p12 = scmp.lt.s32.totalorder %s1827_s4, %s1827_s4 }
  0x44   :  { %2189 = vmatpush3.bf16.msra.mxu1 %v2509_v4  ;;  %2178 = vmatprep.subr.bf16.mxu0 %v2510_v5  ;;  %v368_v19 = vrot.slane %v2011_v14, 7  ;;  %v371_v20 = vrot.slane %v2012_v15, 7  ;;  %v367_v23 = vrot.slane %v366_v18, 4  ;;  %383 = vst.msk [vmem:[#allocation2] sm:$0xe] %vm382_vm3, %v366_v18  ;;  %v102_v63 = vadd.s32 104, %v2786_v54  ;;  %p2666_p11 = scmp.ne.s32.totalorder %s1827_s4, %s2665_s19  ;;  %p2671_p13 = scmp.lt.s32.totalorder %s2665_s19, %s2665_s19 }
  0x45   :  { %2190 = vmatprep.subr.bf16.mxu1 %v2511_v6  ;;  %v376_v26 = vrot.slane %v374_v21, 4  ;;  %v216_v59 = vand.u32 7, %v104_v55  ;;  %v209_v61 = vand.u32 7, %v103_v58  ;;  %v2704_v0 = vmov 0.001953125  }
  0x46   :  { %v370_v24 = vrot.slane %v368_v19, 4  ;;  %v373_v25 = vrot.slane %v371_v20, 4  ;;  %v369_v27 = vsel %vm2765_vm4, %v367_v23, %v368_v19  ;;  %v202_v2 = vand.u32 7, %v102_v63  ;;  %p2672_p0 = por %p2671_p13, %p2670_p12 }
  0x47   :  { %2179 = vmatpush3.bf16.msra.mxu0 %v2510_v5  ;;  %385 = vst.msk [vmem:[#allocation2 + $0x4] sm:$0xf] %vm384_vm5, %v369_v27  ;;  %vm2795_vm9 = vcmp.eq.s32.totalorder %v216_v59, %v2792_v60  ;;  %vm2804_vm10 = vcmp.eq.s32.totalorder %v209_v61, %v2792_v60  ;;  %v101_v3 = vadd.s32 96, %v2786_v54  ;;  %v99_v9 = vadd.s32 80, %v2786_v54 }
  0x48   :  { %2191 = vmatpush3.bf16.msra.mxu1 %v2511_v6  ;;  %2180 = vmatprep.subr.bf16.mxu0 %v2512_v7  ;;  %v372_v28 = vsel %vm2765_vm4, %v370_v24, %v371_v20  ;;  %v375_v29 = vsel %vm2765_vm4, %v373_v25, %v374_v21  ;;  %388 = vst.msk [vmem:[#allocation2 + $0x10] sm:$0x1] %vm343_vm0, %v376_v26  ;;  %v100_v6 = vadd.s32 88, %v2786_v54  ;;  %v98_v12 = vadd.s32 72, %v2786_v54  ;;  %p2673_p1 = pnand %p2672_p0, %p2666_p11 }
  0x49   :  { %2192 = vmatprep.subr.bf16.mxu1 %v2513_v8  ;;  %386 = vst.msk [vmem:[#allocation2 + $0x8] sm:$0xf] %vm384_vm5, %v372_v28  ;;  %387 = vst.msk [vmem:[#allocation2 + $0xc] sm:$0xf] %vm384_vm5, %v375_v29  ;;  %vm2822_vm11 = vcmp.eq.s32.totalorder %v202_v2, %v2792_v60  ;;  %v195_v5 = vand.u32 7, %v101_v3  ;;  %v181_v11 = vand.u32 7, %v99_v9 }
  0x4a   :  { %v174_v14 = vand.u32 7, %v98_v12  ;;  %v97_v15 = vadd.s32 64, %v2786_v54  ;;  %v96_v19 = vadd.s32 56, %v2786_v54  ;;  %v94_v25 = vadd.s32 40, %v2786_v54 }
  0x4b   :  { %2181 = vmatpush3.bf16.msra.mxu0 %v2512_v7  ;;  %v401_v30 = vld [vmem:[#allocation2] sm:$0xe]  ;;  %vm2836_vm12 = vcmp.eq.s32.totalorder %v195_v5, %v2792_v60  ;;  %vm2864_vm14 = vcmp.eq.s32.totalorder %v181_v11, %v2792_v60  ;;  %v93_v28 = vadd.s32 32, %v2786_v54  ;;  %v3428_v29 = vmov 0 }
  0x4c   :  { %2193 = vmatpush3.bf16.msra.mxu1 %v2513_v8  ;;  %2198 = vmatprep.subr.bf16.mxu0 %v2516_v22  ;;  %v389_v31 = vld [vmem:[#allocation2] sm:$0xf]  ;;  %v188_v8 = vand.u32 7, %v100_v6  ;;  %vm2878_vm15 = vcmp.eq.s32.totalorder %v174_v14, %v2792_v60  ;;  %v167_v18 = vand.u32 7, %v97_v15  ;;  %v160_v21 = vand.u32 7, %v96_v19 }
  0x4d   :  { %v593_v32 = vld [vmem:[#allocation2] sm:$0xc]  ;;  %2210 = vmatprep.subr.mxu1 %v2703_v57  ;;  %v146_v27 = vand.u32 7, %v94_v25  ;;  %v3019_v19 = vsub.s32 0, %v2786_v54 }
  0x4e   :  { %v390_v33 = vld [vmem:[#allocation2 + $0x4] sm:$0xf]  ;;  %vm2850_vm13 = vcmp.eq.s32.totalorder %v188_v8, %v2792_v60  ;;  %vm2892_vm0 = vcmp.eq.s32.totalorder %v167_v18, %v2792_v60  ;;  %vm2906_vm1 = vcmp.eq.s32.totalorder %v160_v21, %v2792_v60 }
  0x4f   :  { %v1844_v34 = vcombine.low %v401_v30, %v390_v33  ;;  %v1853_v36 = vcombine.low %v389_v31, %v390_v33  ;;  %v2517_v37 = vld [vmem:[#allocation2 + $0x10] ss:$0 sps:$4 sm:$0x11]   ;;  %v1860_v38 = vcombine.low %v593_v32, %v390_v33  ;;  %vm2934_vm3 = vcmp.eq.s32.totalorder %v146_v27, %v2792_v60 }
  0x50   :  { %v2515_v35 = vld [vmem:[#allocation2 + $0x8] sm:$0xff]   ;;  %v429_v41 = vrot.slane %v2517_v37, 1  ;;  %v2521_v49 = vld [vmem:[#allocation2 + $0x10] ss:$0 sps:$4 sm:$0x33]   ;;  %v3429_v29 = vsel %vm2934_vm3, 4294967295, %v3428_v29 }
  0x51   :  { %v426_v39 = vrot.slane %v1844_v34, 1  ;;  %v427_v40 = vrot.slane %v2515_v35, 1  ;;  %2194 = vmatprep.mubr.msk.bf16.mxu1 %vm3386_vm6, %v1853_v36  ;;  %v611_v42 = vrot.slane %v1860_v38, 2  ;;  %v612_v44 = vrot.slane %v2515_v35, 2 }
  0x52   :  { %2195 = vmatmul.mubr.msk.bf16.vlgmr.msra.gmra.mxu1 %vm3386_vm6, %v2515_v35  ;;  %v614_v51 = vrot.slane %v2521_v49, 2  ;;  %v139_v30 = vand.u32 7, %v93_v28  ;;  %v92_v31 = vadd.s32 24, %v2786_v54  ;;  %v3430_v32 = vmov 0 }
  0x53   :  { %v428_v45 = vsel %vm3388_vm7, %v426_v39, %v427_v40  ;;  %v430_v46 = vsel %vm3388_vm7, %v427_v40, %v429_v41  ;;  %v613_v47 = vsel %vm3387_vm8, %v611_v42, %v612_v44  ;;  %2211 = vmatpush3.msk.msra.mxu1 %vm2795_vm9, %v2704_v0  ;;  %v91_v34 = vadd.s32 16, %v2786_v54 }
  0x54   :  { %2182 = vmatprep.mubr.msk.bf16.mxu0 %vm3386_vm6, %v428_v45  ;;  %v615_v52 = vsel %vm3387_vm8, %v612_v44, %v614_v51  ;;  %2212 = vmatprep.subr.mxu1 %v2703_v57  ;;  %vm2948_vm5 = vcmp.eq.s32.totalorder %v139_v30, %v2792_v60  ;;  %v132_v33 = vand.u32 7, %v92_v31  ;;  %v3432_v35 = vmov 0 }
  0x55   :  { %2183 = vmatmul.mubr.msk.bf16.vlgmr.msra.gmra.mxu0 %vm3386_vm6, %v430_v46  ;;  %2213 = vmatpush3.msk.msra.mxu1 %vm2804_vm10, %v2704_v0  ;;  %v3431_v32 = vsel %vm2948_vm5, 4294967295, %v3430_v32  ;;  %v125_v36 = vand.u32 7, %v91_v34  ;;  %v90_v37 = vadd.s32 8, %v2786_v54  ;;  %v111_v38 = vand.u32 7, %v2786_v54 }
  0x56   :  { %2199 = vmatpush3.bf16.msra.mxu0 %v2516_v22  ;;  %2206 = vmatprep.mubr.msk.bf16.mxu0 %vm3386_vm6, %v613_v47  ;;  %v95_v22 = vadd.s32 48, %v2786_v54  ;;  %v3434_v39 = vmov 0  ;;  %vm3397_vm7 = vmmov 0   ;;  %v3436_v41 = vmov 0 }
  0x57   :  { %2200 = vmatprep.subr.bf16.mxu0 %v2518_v43  ;;  %2214 = vmatprep.subr.mxu1 %v2703_v57  ;;  %vm2977_vm8 = vcmp.eq.s32.totalorder %v125_v36, %v2792_v60  ;;  %v118_v40 = vand.u32 7, %v90_v37  ;;  %v3438_v42 = vmov 0 }
  0x58   :  { %2215 = vmatpush3.msk.msra.mxu1 %vm2822_vm11, %v2704_v0  ;;  %v153_v24 = vand.u32 7, %v95_v22  ;;  %v3435_v39 = vsel %vm2977_vm8, 4294967295, %v3434_v39  ;;  %2242 = vmatprep.mubr.msk.f32.mxu1 %vm3397_vm7, %v2703_v57 }
  0x59   :  { %2216 = vmatprep.subr.mxu1 %v2703_v57 }
  0x5a   :  { %2201 = vmatpush3.bf16.msra.mxu0 %v2518_v43  ;;  %2217 = vmatpush3.msk.msra.mxu1 %vm2836_vm12, %v2704_v0  ;;  %vm2920_vm2 = vcmp.eq.s32.totalorder %v153_v24, %v2792_v60 }
  0x5b   :  { %2202 = vmatprep.subr.bf16.mxu0 %v2519_v48  ;;  %2218 = vmatprep.subr.mxu1 %v2703_v57 }
  0x5c   :  { %2219 = vmatpush3.msk.msra.mxu1 %vm2850_vm13, %v2704_v0 }
  0x5d   :  { %2220 = vmatprep.subr.mxu1 %v2703_v57 }
  0x5e   :  { %2203 = vmatpush3.bf16.msra.mxu0 %v2519_v48  ;;  %2221 = vmatpush3.msk.msra.mxu1 %vm2864_vm14, %v2704_v0 }
  0x5f   :  { %2204 = vmatprep.subr.bf16.mxu0 %v2520_v50  ;;  %2222 = vmatprep.subr.mxu1 %v2703_v57 }
  0x60   :  { %2223 = vmatpush3.msk.msra.mxu1 %vm2878_vm15, %v2704_v0 }
  0x61   :  { %2224 = vmatprep.subr.mxu1 %v2703_v57 }
  0x62   :  { %2205 = vmatpush3.bf16.msra.mxu0 %v2520_v50  ;;  %2225 = vmatpush3.msk.msra.mxu1 %vm2892_vm0, %v2704_v0 }
  0x63   :  { %2245 = vmatprep.subr.mxu0 %v2703_v57  ;;  %2226 = vmatprep.subr.mxu1 %v2703_v57 }
  0x64   :  { %2227 = vmatpush3.msk.msra.mxu1 %vm2906_vm1, %v2704_v0 }
  0x65   :  { %2207 = vmatmul.mubr.msk.bf16.vlgmr.msra.gmra.mxu0 %vm3386_vm6, %v615_v52  ;;  %2228 = vmatprep.subr.mxu1 %v2703_v57  ;;  %vm2962_vm6 = vcmp.eq.s32.totalorder %v132_v33, %v2792_v60 }
  0x66   :  { %2246 = vmatpush3.msk.msra.mxu0 %vm2795_vm9, %v2704_v0  ;;  %2229 = vmatpush3.msk.msra.mxu1 %vm2920_vm2, %v2704_v0  ;;  %v3433_v35 = vsel %vm2962_vm6, 4294967295, %v3432_v35 }
  0x67   :  { %2247 = vmatprep.subr.mxu0 %v2703_v57  ;;  %2230 = vmatprep.subr.mxu1 %v2703_v57 }
  0x68   :  { %2248 = vmatpush3.msk.msra.mxu0 %vm2804_vm10, %v2704_v0  ;;  %2231 = vmatpush3.msk.msra.mxu1 %vm2934_vm3, %v2704_v0 }
  0x69   :  { %2249 = vmatprep.subr.mxu0 %v2703_v57  ;;  %2232 = vmatprep.subr.mxu1 %v2703_v57 }
  0x6a   :  { %2250 = vmatpush3.msk.msra.mxu0 %vm2822_vm11, %v2704_v0  ;;  %2233 = vmatpush3.msk.msra.mxu1 %vm2948_vm5, %v2704_v0 }
  0x6b   :  { %2251 = vmatprep.subr.mxu0 %v2703_v57  ;;  %2234 = vmatprep.subr.mxu1 %v2703_v57 }
  0x6c   :  { %2252 = vmatpush3.msk.msra.mxu0 %vm2836_vm12, %v2704_v0  ;;  %2235 = vmatpush3.msk.msra.mxu1 %vm2962_vm6, %v2704_v0 }
  0x6d   :  { %2253 = vmatprep.subr.mxu0 %v2703_v57  ;;  %2236 = vmatprep.subr.mxu1 %v2703_v57 }
  0x6e   :  { %2254 = vmatpush3.msk.msra.mxu0 %vm2850_vm13, %v2704_v0  ;;  %2237 = vmatpush3.msk.msra.mxu1 %vm2977_vm8, %v2704_v0 }
  0x6f   :  { %2255 = vmatprep.subr.mxu0 %v2703_v57  ;;  %2238 = vmatprep.subr.mxu1 %v2703_v57 }
  0x70   :  { %2256 = vmatpush3.msk.msra.mxu0 %vm2864_vm14, %v2704_v0  ;;  %2277 = vmatprep.mubr.msk.f32.mxu0 %vm3397_vm7, %v2703_v57 }
  0x71   :  { %2257 = vmatprep.subr.mxu0 %v2703_v57 }
  0x72   :  { %2258 = vmatpush3.msk.msra.mxu0 %vm2878_vm15, %v2704_v0 }
  0x73   :  { %2259 = vmatprep.subr.mxu0 %v2703_v57 }
  0x74   :  { %2260 = vmatpush3.msk.msra.mxu0 %vm2892_vm0, %v2704_v0 }
  0x75   :  { %2261 = vmatprep.subr.mxu0 %v2703_v57 }
  0x76   :  { %2262 = vmatpush3.msk.msra.mxu0 %vm2906_vm1, %v2704_v0 }
  0x77   :  { %2263 = vmatprep.subr.mxu0 %v2703_v57 }
  0x78   :  { %2264 = vmatpush3.msk.msra.mxu0 %vm2920_vm2, %v2704_v0 }
  0x79   :  { %2265 = vmatprep.subr.mxu0 %v2703_v57 }
  0x7a   :  { %2266 = vmatpush3.msk.msra.mxu0 %vm2934_vm3, %v2704_v0 }
  0x7b   :  { %2267 = vmatprep.subr.mxu0 %v2703_v57 }
  0x7c   :  { %2268 = vmatpush3.msk.msra.mxu0 %vm2948_vm5, %v2704_v0  ;;  %vm2994_vm5 = vcmp.eq.s32.totalorder %v111_v38, %v2792_v60 }
  0x7d   :  { %2269 = vmatprep.subr.mxu0 %v2703_v57  ;;  %v3439_v42 = vsel %vm2994_vm5, 4294967295, %v3438_v42 }
  0x7e   :  { %2270 = vmatpush3.msk.msra.mxu0 %vm2962_vm6, %v2704_v0  ;;  %vm2989_vm6 = vcmp.eq.s32.totalorder %v118_v40, %v2792_v60 }
  0x7f   :  { %2271 = vmatprep.subr.mxu0 %v2703_v57  ;;  %v3437_v41 = vsel %vm2989_vm6, 4294967295, %v3436_v41  ;;  %2239 = vmatpush3.msk.msra.mxu1 %vm2989_vm6, %v2704_v0 }
  0x80   :  { %2272 = vmatpush3.msk.msra.mxu0 %vm2977_vm8, %v2704_v0  ;;  %2240 = vmatprep.subr.mxu1 %v2703_v57 }
  0x81   :  { %2273 = vmatprep.subr.mxu0 %v2703_v57  ;;  %2241 = vmatpush3.msk.msra.mxu1 %vm2994_vm5, %v2704_v0 }
  0x82   :  { %2274 = vmatpush3.msk.msra.mxu0 %vm2989_vm6, %v2704_v0  ;;  %vm3442_vm6 = vcmask 1045504  }
  0x83   :  { %2275 = vmatprep.subr.mxu0 %v2703_v57 }
  0x84   :  { %2276 = vmatpush3.msk.msra.mxu0 %vm2994_vm5, %v2704_v0 }
 0x112   :  { %v2196_v44 = vpop.f32.mrf.mxu1 }
 0x114   :  { %v578_v46 = vpop.f32.mrf.mxu1 }
 0x115   :  { %v2184_v43 = vpop.f32.mrf.mxu0 }
 0x116   :  { %v2197_v48 = vpop.f32.mrf.mxu1  ;;  %v587_v59 = vadd.f32 %v2196_v44, %v2184_v43 }
 0x117   :  { %v496_v45 = vpop.f32.mrf.mxu0 }
 0x118   :  { %v581_v51 = vpop.f32.mrf.mxu1  ;;  %v579_v55 = vadd.f32 %v578_v46, %v496_v45 }
 0x119   :  { %v2185_v47 = vpop.f32.mrf.mxu0 }
 0x11a   :  { %v590_v63 = vadd.f32 %v2197_v48, %v2185_v47  ;;  %v2522_v48 = vld [vmem:[#allocation10 + $0x38] sm:$0xff]  }
 0x11b   :  { %v499_v49 = vpop.f32.mrf.mxu0  ;;  %2300 = vmatprep.subr.bf16.mxu0 %v2522_v48 }
 0x11c   :  { %v582_v56 = vadd.f32 %v581_v51, %v499_v49  ;;  %v2523_v49 = vld [vmem:[#allocation10 + $0x78] sm:$0xff]   ;;  %v2525_v51 = vld [vmem:[#allocation10 + $0x70] sm:$0xff]  }
 0x11d   :  { %2280 = vmatprep.subr.bf16.mxu1 %v2523_v49 }
 0x125   :  { %v2208_v50 = vpop.f32.mrf.mxu0 }
 0x126   :  { %v697_v2 = vadd.f32 %v2208_v50, %v587_v59  ;;  %v2524_v50 = vld [vmem:[#allocation10 + $0x30] sm:$0xff]   ;;  %v2531_v59 = vld [vmem:[#allocation10 + $0x58] sm:$0xff]  }
 0x127   :  { %v680_v52 = vpop.f32.mrf.mxu0 }
 0x128   :  { %v695_v60 = vadd.f32 %v680_v52, %v579_v55  ;;  %v2526_v52 = vld [vmem:[#allocation10 + $0x28] sm:$0xff]   ;;  %v2528_v55 = vld [vmem:[#allocation10 + $0x20] sm:$0xff]  }
 0x129   :  { %v2209_v53 = vpop.f32.mrf.mxu0 }
 0x12a   :  { %v698_v5 = vadd.f32 %v2209_v53, %v590_v63  ;;  %v2527_v53 = vld [vmem:[#allocation10 + $0x68] sm:$0xff]  }
 0x12b   :  { %v683_v58 = vpop.f32.mrf.mxu0  ;;  %v2534_v63 = vld [vmem:[#allocation10 + $0x8] sm:$0xff]  }
 0x12c   :  { %v696_v61 = vadd.f32 %v683_v58, %v582_v56  ;;  %v2529_v56 = vld [vmem:[#allocation10 + $0x60] sm:$0xff]   ;;  %v2530_v58 = vld [vmem:[#allocation10 + $0x18] sm:$0xff]  }
 0x12e   :  { %v701_v3 = vadd.f32 %v696_v61, %v695_v60 }
 0x130   :  { %v702_v6 = vadd.f32 %v701_v3, %v697_v2  ;;  %v2536_v3 = vld [vmem:[#allocation10] sm:$0xff]  }
 0x132   :  { %v703_v8 = vadd.f32 %v702_v6, %v698_v5  ;;  %v3039_v6 = vld [vmem:[#allocation10 + $0xb8] sm:$0xff]  }
 0x134   :  { %v704_v9 = vrot.slane %v703_v8, 4 }
 0x136   :  { %v705_v11 = vadd.f32 %v704_v9, %v703_v8 }
 0x138   :  { %v706_v12 = vrot.slane %v705_v11, 2 }
 0x13a   :  { %v707_v14 = vadd.f32 %v706_v12, %v705_v11  ;;  %v699_v12 = vld [vmem:[#allocation7] sm:$0x1] }
 0x13c   :  { %v708_v15 = vrot.slane %v707_v14, 1 }
 0x13e   :  { %v709_v18 = vadd.f32 %v708_v15, %v707_v14 }
 0x140   :  { %2243 = vmatmul.mubr.f32.vlgmr.msra.gmra.mxu1 %v709_v18 }
 0x141   :  { %2281 = vmatpush3.bf16.msra.mxu1 %v2523_v49 }
 0x142   :  { %2282 = vmatprep.subr.bf16.mxu1 %v2525_v51 }
 0x145   :  { %2283 = vmatpush3.bf16.msra.mxu1 %v2525_v51 }
 0x146   :  { %2284 = vmatprep.subr.bf16.mxu1 %v2527_v53 }
 0x149   :  { %2285 = vmatpush3.bf16.msra.mxu1 %v2527_v53 }
 0x14a   :  { %2286 = vmatprep.subr.bf16.mxu1 %v2529_v56 }
 0x14d   :  { %2287 = vmatpush3.bf16.msra.mxu1 %v2529_v56 }
 0x14e   :  { %2288 = vmatprep.subr.bf16.mxu1 %v2531_v59 }
 0x151   :  { %2289 = vmatpush3.bf16.msra.mxu1 %v2531_v59 }
 0x200   :  { %v776_v21 = vpop.f32.mrf.mxu1 }
 0x201   :  { %v783_v22 = vrot.slane %v776_v21, %v3019_v19  ;;  %v1900_v21 = vld [vmem:[#allocation7 + $0x1] ss:$0 sm:$0xff] }
 0x202   :  { %v2244_v24 = vpop.f32.mrf.mxu1 }
 0x203   :  { %v3022_v25 = vsub.f32 %v695_v60, %v783_v22  ;;  %v3024_v27 = vsub.f32 %v696_v61, %v783_v22  ;;  %v3026_v28 = vsub.f32 %v697_v2, %v783_v22  ;;  %v3028_v30 = vsub.f32 %v698_v5, %v783_v22  ;;  %v2532_v60 = vld [vmem:[#allocation10 + $0x10] sm:$0xff]   ;;  %v2535_v2 = vld [vmem:[#allocation10 + $0x48] sm:$0xff]   ;;  %v2537_v5 = vld [vmem:[#allocation10 + $0x40] sm:$0xff]  }
 0x204   :  { %v2533_v61 = vld [vmem:[#allocation10 + $0x50] sm:$0xff]  }
 0x205   :  { %v788_v31 = vmul.f32 %v3022_v25, %v3022_v25  ;;  %v789_v33 = vmul.f32 %v3024_v27, %v3024_v27  ;;  %v790_v54 = vmul.f32 %v3026_v28, %v3026_v28  ;;  %v791_v36 = vmul.f32 %v3028_v30, %v3028_v30  ;;  %2290 = vmatprep.subr.bf16.mxu1 %v2533_v61 }
 0x206   :  { %2291 = vmatpush3.bf16.msra.mxu1 %v2533_v61 }
 0x207   :  { %v792_v34 = vadd.f32 %v789_v33, %v788_v31  ;;  %2292 = vmatprep.subr.bf16.mxu1 %v2535_v2 }
 0x209   :  { %v793_v37 = vadd.f32 %v792_v34, %v790_v54 }
 0x20a   :  { %2293 = vmatpush3.bf16.msra.mxu1 %v2535_v2 }
 0x20b   :  { %v794_v38 = vadd.f32 %v793_v37, %v791_v36  ;;  %2294 = vmatprep.subr.bf16.mxu1 %v2537_v5 }
 0x20d   :  { %v795_v40 = vrot.slane %v794_v38, 4 }
 0x20e   :  { %2295 = vmatpush3.bf16.msra.mxu1 %v2537_v5 }
 0x20f   :  { %v796_v43 = vadd.f32 %v795_v40, %v794_v38  ;;  %2320 = vmatprep.subr.bf16.mxu1 %v3039_v6 }
 0x211   :  { %v797_v44 = vrot.slane %v796_v43, 2 }
 0x213   :  { %v798_v45 = vadd.f32 %v797_v44, %v796_v43 }
 0x215   :  { %v799_v46 = vrot.slane %v798_v45, 1 }
 0x217   :  { %v800_v47 = vadd.f32 %v799_v46, %v798_v45 }
 0x219   :  { %2278 = vmatmul.mubr.f32.vlgmr.msra.gmra.mxu0 %v800_v47 }
 0x21a   :  { %2301 = vmatpush3.bf16.msra.mxu0 %v2522_v48 }
 0x21b   :  { %2302 = vmatprep.subr.bf16.mxu0 %v2524_v50 }
 0x21e   :  { %2303 = vmatpush3.bf16.msra.mxu0 %v2524_v50 }
 0x21f   :  { %2304 = vmatprep.subr.bf16.mxu0 %v2526_v52 }
 0x222   :  { %2305 = vmatpush3.bf16.msra.mxu0 %v2526_v52 }
 0x223   :  { %2306 = vmatprep.subr.bf16.mxu0 %v2528_v55 }
 0x226   :  { %2307 = vmatpush3.bf16.msra.mxu0 %v2528_v55 }
 0x227   :  { %2308 = vmatprep.subr.bf16.mxu0 %v2530_v58 }
 0x22a   :  { %2309 = vmatpush3.bf16.msra.mxu0 %v2530_v58 }
 0x22b   :  { %2310 = vmatprep.subr.bf16.mxu0 %v2532_v60 }
 0x22e   :  { %2311 = vmatpush3.bf16.msra.mxu0 %v2532_v60 }
 0x22f   :  { %2312 = vmatprep.subr.bf16.mxu0 %v2534_v63 }
 0x232   :  { %2313 = vmatpush3.bf16.msra.mxu0 %v2534_v63 }
 0x233   :  { %2314 = vmatprep.subr.bf16.mxu0 %v2536_v3 }
 0x236   :  { %2315 = vmatpush3.bf16.msra.mxu0 %v2536_v3 }
 0x237   :  { %2340 = vmatprep.subr.mxu0 %v2703_v57 }
 0x2d9   :  { %v867_v8 = vpop.f32.mrf.mxu0 }
 0x2da   :  { %v868_v9 = vadd.f32 1e-05, %v867_v8 }
 0x2db   :  { %v2279_v11 = vpop.f32.mrf.mxu0 }
 0x2dc   :  { %2559 = vrsqrt.f32 %v868_v9 }
 0x2e9   :  { %v2560_v14 = vpop.eup %2559 }
 0x2ea   :  { %v872_v15 = vmul.f32 %v2560_v14, %v699_v12 }
 0x2ec   :  { %v876_v18 = vrot.slane %v872_v15, %v3019_v19 }
 0x2ee   :  { %v877_v22 = vmul.f32 %v876_v18, %v3022_v25  ;;  %v878_v24 = vmul.f32 %v876_v18, %v3024_v27  ;;  %v879_v31 = vmul.f32 %v876_v18, %v3026_v28  ;;  %v880_v33 = vmul.f32 %v876_v18, %v3028_v30  ;;  %v2544_v18 = vld [vmem:[#allocation10 + $0xb0] sm:$0xff]  }
 0x2f0   :  { %v885_v54 = vadd.f32 %v1900_v21, %v877_v22  ;;  %v886_v34 = vadd.f32 %v1900_v21, %v878_v24  ;;  %v887_v36 = vadd.f32 %v1900_v21, %v879_v31  ;;  %v888_v37 = vadd.f32 %v1900_v21, %v880_v33  ;;  %v2545_v24 = vld [vmem:[#allocation10 + $0xa8] sm:$0xff]   ;;  %v2546_v31 = vld [vmem:[#allocation10 + $0xa0] sm:$0xff]   ;;  %v2548_v33 = vld [vmem:[#allocation10 + $0x90] sm:$0xff]  }
 0x2f2   :  { %v889_v38 = vmax.f32 %v885_v54, 0.0  ;;  %v890_v40 = vmax.f32 %v886_v34, 0.0  ;;  %v891_v43 = vmax.f32 %v887_v36, 0.0  ;;  %v892_v44 = vmax.f32 %v888_v37, 0.0  ;;  %v2549_v54 = vld [vmem:[#allocation10 + $0x88] sm:$0xff]   ;;  %v2550_v34 = vld [vmem:[#allocation10 + $0x80] sm:$0xff]  }
 0x2f4   :  { %v2014_v45 = vpack.c.bf16 %v889_v38, %v889_v38  ;;  %v2015_v46 = vpack.c.bf16 %v890_v40, %v890_v40  ;;  %v2016_v47 = vpack.c.bf16 %v891_v43, %v891_v43  ;;  %v2017_v48 = vpack.c.bf16 %v892_v44, %v892_v44  ;;  %v2552_v40 = vld [vmem:[#allocation12 + $0x18] sm:$0xff]  }
 0x2f6   :  { %v907_v49 = vrot.slane %v2014_v45, 7  ;;  %v909_v25 = vrot.slane %v2015_v46, 7  ;;  %v912_v50 = vrot.slane %v2016_v47, 7  ;;  %v915_v27 = vrot.slane %v2017_v48, 7 }
 0x2f8   :  { %v908_v51 = vrot.slane %v907_v49, 4  ;;  %v911_v28 = vrot.slane %v909_v25, 4  ;;  %v914_v52 = vrot.slane %v912_v50, 4  ;;  %v917_v30 = vrot.slane %v915_v27, 4  ;;  %923 = vst [vmem:[#allocation3] sm:$0xe] %v907_v49 }
 0x2fa   :  { %v910_v53 = vsel %vm2765_vm4, %v908_v51, %v909_v25  ;;  %v913_v55 = vsel %vm2765_vm4, %v911_v28, %v912_v50  ;;  %v916_v56 = vsel %vm2765_vm4, %v914_v52, %v915_v27  ;;  %927 = vst [vmem:[#allocation3 + $0x10] sm:$0x1] %v917_v30  ;;  %vm3440_vm4 = vcmask 1046528  }
 0x2fb   :  { %924 = vst [vmem:[#allocation3 + $0x4] sm:$0xf] %v910_v53  ;;  %925 = vst [vmem:[#allocation3 + $0x8] sm:$0xf] %v913_v55 }
 0x2fc   :  { %926 = vst [vmem:[#allocation3 + $0xc] sm:$0xf] %v916_v56  ;;  %vm3441_vm5 = vmmov %vm3440_vm4 }
 0x2ff   :  { %v928_v58 = vld [vmem:[#allocation3] sm:$0xf] }
 0x300   :  { %v948_v59 = vld [vmem:[#allocation3] sm:$0xe] }
 0x301   :  { %v1186_v60 = vld [vmem:[#allocation3] sm:$0xc]  ;;  %v2542_v61 = vld [vmem:[#allocation3 + $0x10] ss:$0 sps:$4 sm:$0x11]  }
 0x302   :  { %v929_v63 = vld [vmem:[#allocation3 + $0x4] sm:$0xf]  ;;  %v983_v9 = vrot.slane %v2542_v61, 1  ;;  %v2551_v36 = vld [vmem:[#allocation3 + $0x10] ss:$0 sps:$4 sm:$0x33]  }
 0x303   :  { %v1916_v2 = vcombine.low %v928_v58, %v929_v63  ;;  %v3053_v3 = vld [vmem:[#allocation3 + $0x8] sm:$0xff]   ;;  %v1905_v5 = vcombine.low %v948_v59, %v929_v63  ;;  %v1925_v8 = vcombine.low %v1186_v60, %v929_v63  ;;  %v1214_v37 = vrot.slane %v2551_v36, 2 }
 0x304   :  { %v981_v17 = vrot.slane %v3053_v3, 1  ;;  %v1212_v14 = vrot.slane %v3053_v3, 2 }
 0x305   :  { %2316 = vmatprep.mubr.bf16.mxu0 %v1916_v2  ;;  %v980_v11 = vrot.slane %v1905_v5, 1  ;;  %v1211_v12 = vrot.slane %v1925_v8, 2  ;;  %v2556_v8 = vld [vmem:[#allocation2] sm:$0xfe]  }
 0x306   :  { %2317 = vmatmul.mubr.bf16.vlgmr.msra.gmra.mxu0 %v3053_v3  ;;  %v984_v21 = vsel %vm3441_vm5, %v981_v17, %v983_v9  ;;  %vm3444_vm5 = vnez %v3433_v35  ;;  %v2557_v9 = vld [vmem:[#allocation2 + $0x8] sm:$0xff]  }
 0x307   :  { %v982_v15 = vsel %vm3440_vm4, %v980_v11, %v981_v17  ;;  %2341 = vmatpush3.msk.msra.mxu0 %vm2795_vm9, %v2704_v0  ;;  %2372 = vmatprep.mubr.msk.f32.mxu0 %vm3397_vm7, %v2703_v57  ;;  %v1213_v22 = vsel %vm3442_vm6, %v1211_v12, %v1212_v14  ;;  %vm3443_vm6 = vnez %v3431_v32  ;;  %vm3445_vm4 = vnez %v3437_v41 }
 0x308   :  { %2296 = vmatprep.mubr.bf16.mxu1 %v982_v15  ;;  %2342 = vmatprep.subr.mxu0 %v2703_v57  ;;  %vm3446_vm7 = vnez %v3439_v42  ;;  %v1535_v12 = vrot.slane %v2556_v8, 1 }
 0x309   :  { %2297 = vmatmul.mubr.bf16.vlgmr.msra.gmra.mxu1 %v984_v21  ;;  %2343 = vmatpush3.msk.msra.mxu0 %vm2804_vm10, %v2704_v0  ;;  %v2553_v21 = vld [vmem:[#allocation12 + $0x10] sm:$0xff]  }
 0x30a   :  { %2321 = vmatpush3.bf16.msra.mxu1 %v3039_v6  ;;  %2336 = vmatprep.mubr.bf16.mxu1 %v1213_v22  ;;  %v2547_v6 = vld [vmem:[#allocation10 + $0x98] sm:$0xff]  }
 0x30b   :  { %2322 = vmatprep.subr.bf16.mxu1 %v2544_v18  ;;  %2344 = vmatprep.subr.mxu0 %v2703_v57 }
 0x30c   :  { %2345 = vmatpush3.msk.msra.mxu0 %vm2822_vm11, %v2704_v0 }
 0x30d   :  { %2346 = vmatprep.subr.mxu0 %v2703_v57 }
 0x30e   :  { %2323 = vmatpush3.bf16.msra.mxu1 %v2544_v18  ;;  %2347 = vmatpush3.msk.msra.mxu0 %vm2836_vm12, %v2704_v0 }
 0x30f   :  { %2324 = vmatprep.subr.bf16.mxu1 %v2545_v24  ;;  %2348 = vmatprep.subr.mxu0 %v2703_v57 }
 0x310   :  { %2349 = vmatpush3.msk.msra.mxu0 %vm2850_vm13, %v2704_v0 }
 0x311   :  { %2350 = vmatprep.subr.mxu0 %v2703_v57 }
 0x312   :  { %2325 = vmatpush3.bf16.msra.mxu1 %v2545_v24  ;;  %2351 = vmatpush3.msk.msra.mxu0 %vm2864_vm14, %v2704_v0  ;;  %v2554_v24 = vld [vmem:[#allocation12 + $0x8] sm:$0xff]  }
 0x313   :  { %2326 = vmatprep.subr.bf16.mxu1 %v2546_v31  ;;  %2352 = vmatprep.subr.mxu0 %v2703_v57 }
 0x314   :  { %2353 = vmatpush3.msk.msra.mxu0 %vm2878_vm15, %v2704_v0 }
 0x315   :  { %2354 = vmatprep.subr.mxu0 %v2703_v57 }
 0x316   :  { %2327 = vmatpush3.bf16.msra.mxu1 %v2546_v31  ;;  %2355 = vmatpush3.msk.msra.mxu0 %vm2892_vm0, %v2704_v0  ;;  %v2558_v31 = vld [vmem:[#allocation2 + $0x10] ss:$0 sps:$4 sm:$0x11]  }
 0x317   :  { %2328 = vmatprep.subr.bf16.mxu1 %v2547_v6  ;;  %2356 = vmatprep.subr.mxu0 %v2703_v57 }
 0x318   :  { %2357 = vmatpush3.msk.msra.mxu0 %vm2906_vm1, %v2704_v0 }
 0x319   :  { %2358 = vmatprep.subr.mxu0 %v2703_v57 }
 0x31a   :  { %2329 = vmatpush3.bf16.msra.mxu1 %v2547_v6  ;;  %2359 = vmatpush3.msk.msra.mxu0 %vm2920_vm2, %v2704_v0  ;;  %v2555_v6 = vld [vmem:[#allocation12] sm:$0xff]  }
 0x31b   :  { %2330 = vmatprep.subr.bf16.mxu1 %v2548_v33  ;;  %2360 = vmatprep.subr.mxu0 %v2703_v57 }
 0x31c   :  { %2361 = vmatpush3.msk.msra.mxu0 %vm2934_vm3, %v2704_v0 }
 0x31d   :  { %2362 = vmatprep.subr.mxu0 %v2703_v57 }
 0x31e   :  { %2331 = vmatpush3.bf16.msra.mxu1 %v2548_v33  ;;  %2363 = vmatpush3.msk.msra.mxu0 %vm3443_vm6, %v2704_v0  ;;  %v1538_v33 = vrot.slane %v2558_v31, 1 }
 0x31f   :  { %2332 = vmatprep.subr.bf16.mxu1 %v2549_v54  ;;  %2364 = vmatprep.subr.mxu0 %v2703_v57 }
 0x320   :  { %2365 = vmatpush3.msk.msra.mxu0 %vm3444_vm5, %v2704_v0 }
 0x321   :  { %2366 = vmatprep.subr.mxu0 %v2703_v57 }
 0x322   :  { %2333 = vmatpush3.bf16.msra.mxu1 %v2549_v54  ;;  %2367 = vmatpush3.msk.msra.mxu0 %vm2977_vm8, %v2704_v0  ;;  %vm3447_vm8 = vcmask 1045504  }
 0x323   :  { %2334 = vmatprep.subr.bf16.mxu1 %v2550_v34  ;;  %2368 = vmatprep.subr.mxu0 %v2703_v57  ;;  %v1215_v38 = vsel %vm3447_vm8, %v1212_v14, %v1214_v37  ;;  %vm3449_vm8 = vnez %v3435_v39  ;;  %v1536_v14 = vrot.slane %v2557_v9, 1 }
 0x324   :  { %2369 = vmatpush3.msk.msra.mxu0 %vm3445_vm4, %v2704_v0  ;;  %vm3448_vm4 = vmmov 0  }
 0x325   :  { %2370 = vmatprep.subr.mxu0 %v2703_v57 }
 0x326   :  { %2335 = vmatpush3.bf16.msra.mxu1 %v2550_v34  ;;  %2371 = vmatpush3.msk.msra.mxu0 %vm3446_vm7, %v2704_v0 }
 0x327   :  { %2375 = vmatprep.subr.mxu1 %v2703_v57  ;;  %2410 = vmatprep.subr.bf16.mxu0 %v2552_v40 }
 0x329   :  { %2337 = vmatmul.mubr.bf16.vlgmr.msra.gmra.mxu1 %v1215_v38 }
 0x32a   :  { %2376 = vmatpush3.msk.msra.mxu1 %vm2795_vm9, %v2704_v0  ;;  %2407 = vmatprep.mubr.msk.f32.mxu1 %vm3448_vm4, %v2703_v57 }
 0x32b   :  { %2377 = vmatprep.subr.mxu1 %v2703_v57 }
 0x32c   :  { %2378 = vmatpush3.msk.msra.mxu1 %vm2804_vm10, %v2704_v0 }
 0x32d   :  { %2379 = vmatprep.subr.mxu1 %v2703_v57 }
 0x32e   :  { %2380 = vmatpush3.msk.msra.mxu1 %vm2822_vm11, %v2704_v0 }
 0x32f   :  { %2381 = vmatprep.subr.mxu1 %v2703_v57 }
 0x330   :  { %2382 = vmatpush3.msk.msra.mxu1 %vm2836_vm12, %v2704_v0 }
 0x331   :  { %2383 = vmatprep.subr.mxu1 %v2703_v57 }
 0x332   :  { %2384 = vmatpush3.msk.msra.mxu1 %vm2850_vm13, %v2704_v0 }
 0x333   :  { %2385 = vmatprep.subr.mxu1 %v2703_v57 }
 0x334   :  { %2386 = vmatpush3.msk.msra.mxu1 %vm2864_vm14, %v2704_v0 }
 0x335   :  { %2387 = vmatprep.subr.mxu1 %v2703_v57 }
 0x336   :  { %2388 = vmatpush3.msk.msra.mxu1 %vm2878_vm15, %v2704_v0 }
 0x337   :  { %2389 = vmatprep.subr.mxu1 %v2703_v57 }
 0x338   :  { %2390 = vmatpush3.msk.msra.mxu1 %vm2892_vm0, %v2704_v0 }
 0x339   :  { %2391 = vmatprep.subr.mxu1 %v2703_v57 }
 0x33a   :  { %2392 = vmatpush3.msk.msra.mxu1 %vm2906_vm1, %v2704_v0 }
 0x33b   :  { %2393 = vmatprep.subr.mxu1 %v2703_v57 }
 0x33c   :  { %2394 = vmatpush3.msk.msra.mxu1 %vm2920_vm2, %v2704_v0 }
 0x33d   :  { %2395 = vmatprep.subr.mxu1 %v2703_v57 }
 0x33e   :  { %2396 = vmatpush3.msk.msra.mxu1 %vm2934_vm3, %v2704_v0  ;;  %vm3450_vm3 = vnez %v3437_v41 }
 0x33f   :  { %2397 = vmatprep.subr.mxu1 %v2703_v57 }
 0x340   :  { %2398 = vmatpush3.msk.msra.mxu1 %vm3443_vm6, %v2704_v0 }
 0x341   :  { %2399 = vmatprep.subr.mxu1 %v2703_v57 }
 0x342   :  { %2400 = vmatpush3.msk.msra.mxu1 %vm3444_vm5, %v2704_v0 }
 0x343   :  { %2401 = vmatprep.subr.mxu1 %v2703_v57 }
 0x344   :  { %2402 = vmatpush3.msk.msra.mxu1 %vm3449_vm8, %v2704_v0 }
 0x345   :  { %2403 = vmatprep.subr.mxu1 %v2703_v57 }
 0x346   :  { %2404 = vmatpush3.msk.msra.mxu1 %vm3450_vm3, %v2704_v0  ;;  %vm3452_vm3 = vcmask 523264  }
 0x347   :  { %2405 = vmatprep.subr.mxu1 %v2703_v57  ;;  %vm3454_vm5 = vmmov %vm3452_vm3 }
 0x348   :  { %2406 = vmatpush3.msk.msra.mxu1 %vm3446_vm7, %v2704_v0  ;;  %vm3451_vm7 = vcmask 1046528  }
 0x349   :  { %2457 = vmatprep.subr.mxu1 %v2703_v57  ;;  %v1537_v22 = vsel %vm3451_vm7, %v1535_v12, %v1536_v14  ;;  %vm3453_vm8 = vmmov %vm3451_vm7  ;;  %vm3455_vm7 = vnez %v3429_v29 }
 0x34a   :  { %v1539_v54 = vsel %vm3453_vm8, %v1536_v14, %v1538_v33  ;;  %vm3458_vm8 = vnez %v3437_v41 }
 0x3c6   :  { %v2318_v45 = vpop.f32.mrf.mxu0 }
 0x3c8   :  { %v1171_v47 = vpop.f32.mrf.mxu0 }
 0x3c9   :  { %v2298_v43 = vpop.f32.mrf.mxu1 }
 0x3ca   :  { %v2319_v49 = vpop.f32.mrf.mxu0  ;;  %v1180_v53 = vadd.f32 %v2318_v45, %v2298_v43 }
 0x3cb   :  { %v1069_v44 = vpop.f32.mrf.mxu1 }
 0x3cc   :  { %v1174_v27 = vpop.f32.mrf.mxu0  ;;  %v1172_v28 = vadd.f32 %v1171_v47, %v1069_v44 }
 0x3cd   :  { %v2299_v46 = vpop.f32.mrf.mxu1 }
 0x3ce   :  { %v1183_v58 = vadd.f32 %v2319_v49, %v2299_v46 }
 0x3cf   :  { %v1072_v48 = vpop.f32.mrf.mxu1 }
 0x3d0   :  { %v1175_v52 = vadd.f32 %v1174_v27, %v1072_v48 }
 0x3e9   :  { %v2338_v25 = vpop.f32.mrf.mxu1 }
 0x3ea   :  { %v3203_v59 = vadd.f32 %v2338_v25, %v1180_v53 }
 0x3eb   :  { %v1300_v50 = vpop.f32.mrf.mxu1 }
 0x3ec   :  { %v3199_v55 = vadd.f32 %v1300_v50, %v1172_v28 }
 0x3ed   :  { %v2339_v51 = vpop.f32.mrf.mxu1 }
 0x3ee   :  { %v3207_v61 = vadd.f32 %v2339_v51, %v1183_v58 }
 0x3ef   :  { %v1303_v30 = vpop.f32.mrf.mxu1 }
 0x3f0   :  { %v3201_v56 = vadd.f32 %v1303_v30, %v1175_v52 }
 0x3f2   :  { %v1321_v60 = vadd.f32 %v3201_v56, %v3199_v55 }
 0x3f4   :  { %v1322_v63 = vadd.f32 %v1321_v60, %v3203_v59 }
 0x3f6   :  { %v1323_v2 = vadd.f32 %v1322_v63, %v3207_v61 }
 0x3f8   :  { %v1324_v3 = vrot.slane %v1323_v2, 4 }
 0x3fa   :  { %v1325_v5 = vadd.f32 %v1324_v3, %v1323_v2 }
 0x3fc   :  { %v1326_v11 = vrot.slane %v1325_v5, 2 }
 0x3fe   :  { %v1327_v17 = vadd.f32 %v1326_v11, %v1325_v5 }
 0x400   :  { %v1328_v15 = vrot.slane %v1327_v17, 1 }
 0x402   :  { %v1329_v18 = vadd.f32 %v1328_v15, %v1327_v17 }
 0x404   :  { %2373 = vmatmul.mubr.f32.vlgmr.msra.gmra.mxu0 %v1329_v18 }
 0x405   :  { %2411 = vmatpush3.bf16.msra.mxu0 %v2552_v40  ;;  %2418 = vmatprep.mubr.msk.bf16.mxu0 %vm3452_vm3, %v1537_v22  ;;  %vm3456_vm3 = vnez %v3433_v35 }
 0x406   :  { %2412 = vmatprep.subr.bf16.mxu0 %v2553_v21 }
 0x409   :  { %2413 = vmatpush3.bf16.msra.mxu0 %v2553_v21 }
 0x40a   :  { %2414 = vmatprep.subr.bf16.mxu0 %v2554_v24 }
 0x40d   :  { %2415 = vmatpush3.bf16.msra.mxu0 %v2554_v24 }
 0x40e   :  { %2416 = vmatprep.subr.bf16.mxu0 %v2555_v6 }
 0x411   :  { %2417 = vmatpush3.bf16.msra.mxu0 %v2555_v6  ;;  %v1319_v6 = vld [vmem:[#allocation7 + $0x2] sm:$0x1] }
 0x412   :  { %2422 = vmatprep.subr.mxu0 %v2703_v57 }
 0x414   :  { %2419 = vmatmul.mubr.msk.bf16.vlgmr.msra.gmra.mxu0 %vm3454_vm5, %v1539_v54  ;;  %vm3457_vm5 = vnez %v3435_v39 }
 0x415   :  { %2423 = vmatpush3.msk.msra.mxu0 %vm2795_vm9, %v2704_v0  ;;  %2454 = vmatprep.mubr.msk.f32.mxu0 %vm3448_vm4, %v2703_v57 }
 0x416   :  { %2424 = vmatprep.subr.mxu0 %v2703_v57 }
 0x417   :  { %2425 = vmatpush3.msk.msra.mxu0 %vm2804_vm10, %v2704_v0 }
 0x418   :  { %2426 = vmatprep.subr.mxu0 %v2703_v57 }
 0x419   :  { %2427 = vmatpush3.msk.msra.mxu0 %vm2822_vm11, %v2704_v0 }
 0x41a   :  { %2428 = vmatprep.subr.mxu0 %v2703_v57 }
 0x41b   :  { %2429 = vmatpush3.msk.msra.mxu0 %vm2836_vm12, %v2704_v0 }
 0x41c   :  { %2430 = vmatprep.subr.mxu0 %v2703_v57 }
 0x41d   :  { %2431 = vmatpush3.msk.msra.mxu0 %vm2850_vm13, %v2704_v0 }
 0x41e   :  { %2432 = vmatprep.subr.mxu0 %v2703_v57 }
 0x41f   :  { %2433 = vmatpush3.msk.msra.mxu0 %vm2864_vm14, %v2704_v0 }
 0x420   :  { %2434 = vmatprep.subr.mxu0 %v2703_v57 }
 0x421   :  { %2435 = vmatpush3.msk.msra.mxu0 %vm2878_vm15, %v2704_v0 }
 0x422   :  { %2436 = vmatprep.subr.mxu0 %v2703_v57 }
 0x423   :  { %2437 = vmatpush3.msk.msra.mxu0 %vm2892_vm0, %v2704_v0 }
 0x424   :  { %2438 = vmatprep.subr.mxu0 %v2703_v57 }
 0x425   :  { %2439 = vmatpush3.msk.msra.mxu0 %vm2906_vm1, %v2704_v0 }
 0x426   :  { %2440 = vmatprep.subr.mxu0 %v2703_v57 }
 0x427   :  { %2441 = vmatpush3.msk.msra.mxu0 %vm2920_vm2, %v2704_v0 }
 0x428   :  { %2442 = vmatprep.subr.mxu0 %v2703_v57 }
 0x429   :  { %2443 = vmatpush3.msk.msra.mxu0 %vm3455_vm7, %v2704_v0 }
 0x42a   :  { %2444 = vmatprep.subr.mxu0 %v2703_v57 }
 0x42b   :  { %2445 = vmatpush3.msk.msra.mxu0 %vm3443_vm6, %v2704_v0  ;;  %vm3459_vm6 = vnez %v3439_v42 }
 0x42c   :  { %2446 = vmatprep.subr.mxu0 %v2703_v57 }
 0x42d   :  { %2447 = vmatpush3.msk.msra.mxu0 %vm3456_vm3, %v2704_v0 }
 0x42e   :  { %2448 = vmatprep.subr.mxu0 %v2703_v57 }
 0x42f   :  { %2449 = vmatpush3.msk.msra.mxu0 %vm3457_vm5, %v2704_v0 }
 0x430   :  { %2450 = vmatprep.subr.mxu0 %v2703_v57 }
 0x431   :  { %2451 = vmatpush3.msk.msra.mxu0 %vm3458_vm8, %v2704_v0 }
 0x432   :  { %2452 = vmatprep.subr.mxu0 %v2703_v57 }
 0x433   :  { %2453 = vmatpush3.msk.msra.mxu0 %vm3459_vm6, %v2704_v0 }
 0x4c4   :  { %v1396_v34 = vpop.f32.mrf.mxu0 }
 0x4c5   :  { %v1403_v36 = vrot.slane %v1396_v34, %v3019_v19  ;;  %v1619_v34 = vld [vmem:[#allocation7 + $0x4] sm:$0x1] }
 0x4c6   :  { %v2374_v37 = vpop.f32.mrf.mxu0 }
 0x4c7   :  { %v3283_v38 = vsub.f32 %v3199_v55, %v1403_v36  ;;  %v3286_v40 = vsub.f32 %v3201_v56, %v1403_v36  ;;  %v3289_v43 = vsub.f32 %v3203_v59, %v1403_v36  ;;  %v3292_v44 = vsub.f32 %v3207_v61, %v1403_v36 }
 0x4c9   :  { %v1408_v45 = vmul.f32 %v3283_v38, %v3283_v38  ;;  %v1409_v46 = vmul.f32 %v3286_v40, %v3286_v40  ;;  %v1410_v47 = vmul.f32 %v3289_v43, %v3289_v43  ;;  %v1411_v49 = vmul.f32 %v3292_v44, %v3292_v44 }
 0x4cb   :  { %v1412_v48 = vadd.f32 %v1409_v46, %v1408_v45 }
 0x4cd   :  { %v1413_v25 = vadd.f32 %v1412_v48, %v1410_v47 }
 0x4cf   :  { %v1414_v50 = vadd.f32 %v1413_v25, %v1411_v49  ;;  %v1967_v25 = vld [vmem:[#allocation7 + $0x3] ss:$0 sm:$0xff] }
 0x4d1   :  { %v1415_v27 = vrot.slane %v1414_v50, 4 }
 0x4d3   :  { %v1416_v51 = vadd.f32 %v1415_v27, %v1414_v50  ;;  %v2009_v50 = vld [vmem:[#allocation7 + $0x5] ss:$0 sm:$0xff] }
 0x4d4   :  { %v2420_v28 = vpop.f32.mrf.mxu0 }
 0x4d5   :  { %v1417_v52 = vrot.slane %v1416_v51, 2 }
 0x4d6   :  { %v1604_v30 = vpop.f32.mrf.mxu0 }
 0x4d7   :  { %v1418_v53 = vadd.f32 %v1417_v52, %v1416_v51 }
 0x4d8   :  { %v2421_v55 = vpop.f32.mrf.mxu0 }
 0x4d9   :  { %v1419_v56 = vrot.slane %v1418_v53, 1 }
 0x4da   :  { %v1607_v58 = vpop.f32.mrf.mxu0 }
 0x4db   :  { %v1621_v59 = vadd.f32 %v1607_v58, %v1604_v30  ;;  %v1420_v60 = vadd.f32 %v1419_v56, %v1418_v53 }
 0x4dd   :  { %v1622_v61 = vadd.f32 %v2420_v28, %v1621_v59  ;;  %2408 = vmatmul.mubr.f32.vlgmr.msra.gmra.mxu1 %v1420_v60 }
 0x4de   :  { %2458 = vmatpush3.msk.msra.mxu1 %vm2795_vm9, %v2704_v0  ;;  %2489 = vmatprep.mubr.msk.f32.mxu1 %vm3448_vm4, %v2703_v57  ;;  %vm3460_vm9 = vnez %v3431_v32 }
 0x4df   :  { %v1623_v63 = vadd.f32 %v2421_v55, %v1622_v61  ;;  %2459 = vmatprep.subr.mxu1 %v2703_v57 }
 0x4e0   :  { %2460 = vmatpush3.msk.msra.mxu1 %vm2804_vm10, %v2704_v0 }
 0x4e1   :  { %v1624_v2 = vrot.slane %v1623_v63, 4  ;;  %2461 = vmatprep.subr.mxu1 %v2703_v57 }
 0x4e2   :  { %2462 = vmatpush3.msk.msra.mxu1 %vm2822_vm11, %v2704_v0 }
 0x4e3   :  { %v1625_v3 = vadd.f32 %v1624_v2, %v1623_v63  ;;  %2463 = vmatprep.subr.mxu1 %v2703_v57 }
 0x4e4   :  { %2464 = vmatpush3.msk.msra.mxu1 %vm2836_vm12, %v2704_v0 }
 0x4e5   :  { %v1626_v62 = vrot.slane %v1625_v3, 2  ;;  %2465 = vmatprep.subr.mxu1 %v2703_v57 }
 0x4e6   :  { %2466 = vmatpush3.msk.msra.mxu1 %vm2850_vm13, %v2704_v0 }
 0x4e7   :  { %v1627_v1 = vadd.f32 %v1626_v62, %v1625_v3  ;;  %2467 = vmatprep.subr.mxu1 %v2703_v57 }
 0x4e8   :  { %2468 = vmatpush3.msk.msra.mxu1 %vm2864_vm14, %v2704_v0 }
 0x4e9   :  { %v1628_v4 = vrot.slane %v1627_v1, 1  ;;  %2469 = vmatprep.subr.mxu1 %v2703_v57 }
 0x4ea   :  { %2470 = vmatpush3.msk.msra.mxu1 %vm2878_vm15, %v2704_v0 }
 0x4eb   :  { %v1629_v7 = vadd.f32 %v1628_v4, %v1627_v1  ;;  %2471 = vmatprep.subr.mxu1 %v2703_v57 }
 0x4ec   :  { %2472 = vmatpush3.msk.msra.mxu1 %vm2892_vm0, %v2704_v0 }
 0x4ed   :  { %2455 = vmatmul.mubr.f32.vlgmr.msra.gmra.mxu0 %v1629_v7  ;;  %2473 = vmatprep.subr.mxu1 %v2703_v57 }
 0x4ee   :  { %2474 = vmatpush3.msk.msra.mxu1 %vm2906_vm1, %v2704_v0 }
 0x4ef   :  { %2475 = vmatprep.subr.mxu1 %v2703_v57 }
 0x4f0   :  { %2476 = vmatpush3.msk.msra.mxu1 %vm2920_vm2, %v2704_v0 }
 0x4f1   :  { %2477 = vmatprep.subr.mxu1 %v2703_v57 }
 0x4f2   :  { %2478 = vmatpush3.msk.msra.mxu1 %vm3455_vm7, %v2704_v0 }
 0x4f3   :  { %2479 = vmatprep.subr.mxu1 %v2703_v57 }
 0x4f4   :  { %2480 = vmatpush3.msk.msra.mxu1 %vm3460_vm9, %v2704_v0 }
 0x4f5   :  { %2481 = vmatprep.subr.mxu1 %v2703_v57 }
 0x4f6   :  { %2482 = vmatpush3.msk.msra.mxu1 %vm3456_vm3, %v2704_v0 }
 0x4f7   :  { %2483 = vmatprep.subr.mxu1 %v2703_v57 }
 0x4f8   :  { %2484 = vmatpush3.msk.msra.mxu1 %vm3457_vm5, %v2704_v0 }
 0x4f9   :  { %2485 = vmatprep.subr.mxu1 %v2703_v57 }
 0x4fa   :  { %2486 = vmatpush3.msk.msra.mxu1 %vm3458_vm8, %v2704_v0 }
 0x4fb   :  { %2487 = vmatprep.subr.mxu1 %v2703_v57 }
 0x4fc   :  { %2488 = vmatpush3.msk.msra.mxu1 %vm3459_vm6, %v2704_v0 }
 0x59d   :  { %v1487_v10 = vpop.f32.mrf.mxu1 }
 0x59e   :  { %v1488_v18 = vadd.f32 1e-05, %v1487_v10 }
 0x59f   :  { %v2409_v13 = vpop.f32.mrf.mxu1 }
 0x5a0   :  { %2561 = vrsqrt.f32 %v1488_v18 }
 0x5ad   :  { %v1696_v16 = vpop.f32.mrf.mxu0  ;;  %v2562_v31 = vpop.eup %2561 }
 0x5ae   :  { %v1703_v20 = vrot.slane %v1696_v16, %v3019_v19  ;;  %v1492_v33 = vmul.f32 %v2562_v31, %v1319_v6 }
 0x5af   :  { %v2456_v23 = vpop.f32.mrf.mxu0 }
 0x5b0   :  { %v1704_v26 = vsub.f32 %v1604_v30, %v1703_v20  ;;  %v1705_v29 = vsub.f32 %v1607_v58, %v1703_v20  ;;  %v1706_v32 = vsub.f32 %v2420_v28, %v1703_v20  ;;  %v1707_v35 = vsub.f32 %v2421_v55, %v1703_v20 }
 0x5b1   :  { %v1496_v54 = vrot.slane %v1492_v33, %v3019_v19 }
 0x5b2   :  { %v1708_v39 = vmul.f32 %v1704_v26, %v1704_v26  ;;  %v1709_v5 = vmul.f32 %v1705_v29, %v1705_v29  ;;  %v1710_v41 = vmul.f32 %v1706_v32, %v1706_v32  ;;  %v1711_v9 = vmul.f32 %v1707_v35, %v1707_v35 }
 0x5b3   :  { %v1497_v45 = vmul.f32 %v1496_v54, %v3283_v38  ;;  %v1498_v46 = vmul.f32 %v1496_v54, %v3286_v40  ;;  %v1499_v47 = vmul.f32 %v1496_v54, %v3289_v43  ;;  %v1500_v48 = vmul.f32 %v1496_v54, %v3292_v44 }
 0x5b4   :  { %v1712_v8 = vadd.f32 %v1709_v5, %v1708_v39 }
 0x5b5   :  { %v1505_v30 = vadd.f32 %v1967_v25, %v1497_v45  ;;  %v1506_v53 = vadd.f32 %v1967_v25, %v1498_v46  ;;  %v1507_v55 = vadd.f32 %v1967_v25, %v1499_v47  ;;  %v1508_v56 = vadd.f32 %v1967_v25, %v1500_v48 }
 0x5b6   :  { %v1713_v57 = vadd.f32 %v1712_v8, %v1710_v41 }
 0x5b8   :  { %v1714_v11 = vadd.f32 %v1713_v57, %v1711_v9 }
 0x5ba   :  { %v1715_v17 = vrot.slane %v1714_v11, 4 }
 0x5bc   :  { %v1716_v42 = vadd.f32 %v1715_v17, %v1714_v11 }
 0x5be   :  { %v1717_v0 = vrot.slane %v1716_v42, 2 }
 0x5c0   :  { %v1718_v12 = vadd.f32 %v1717_v0, %v1716_v42 }
 0x5c2   :  { %v1719_v14 = vrot.slane %v1718_v12, 1 }
 0x5c4   :  { %v1720_v15 = vadd.f32 %v1719_v14, %v1718_v12 }
 0x5c6   :  { %2490 = vmatmul.mubr.f32.vlgmr.msra.gmra.mxu1 %v1720_v15 }
 0x686   :  { %v1787_v21 = vpop.f32.mrf.mxu1 }
 0x687   :  { %v1788_v22 = vadd.f32 1e-05, %v1787_v21 }
 0x688   :  { %v2491_v24 = vpop.f32.mrf.mxu1 }
 0x689   :  { %2563 = vrsqrt.f32 %v1788_v22 }
 0x696   :  { %v2564_v36 = vpop.eup %2563 }
 0x697   :  { %v1792_v37 = vmul.f32 %v2564_v36, %v1619_v34 }
 0x699   :  { %v1796_v49 = vrot.slane %v1792_v37, %v3019_v19 }
 0x69b   :  { %v1797_v27 = vmul.f32 %v1796_v49, %v1704_v26  ;;  %v1798_v51 = vmul.f32 %v1796_v49, %v1705_v29  ;;  %v1799_v28 = vmul.f32 %v1796_v49, %v1706_v32  ;;  %v1800_v52 = vmul.f32 %v1796_v49, %v1707_v35 }
 0x69d   :  { %v1805_v58 = vadd.f32 %v2009_v50, %v1797_v27  ;;  %v1806_v38 = vadd.f32 %v2009_v50, %v1798_v51  ;;  %v1807_v59 = vadd.f32 %v2009_v50, %v1799_v28  ;;  %v1808_v40 = vadd.f32 %v2009_v50, %v1800_v52 }
 0x69f   :  { %v1809_v43 = vadd.f32 %v1805_v58, %v1505_v30  ;;  %v1810_v44 = vadd.f32 %v1806_v38, %v1506_v53  ;;  %v1811_v60 = vadd.f32 %v1807_v59, %v1507_v55  ;;  %v1812_v19 = vadd.f32 %v1808_v40, %v1508_v56 }
 0x6a1   :  { %v1813_v61 = vmax.f32 %v1809_v43, 0.0  ;;  %v1814_v63 = vmax.f32 %v1810_v44, 0.0  ;;  %v1815_v2 = vmax.f32 %v1811_v60, 0.0  ;;  %v1816_v3 = vmax.f32 %v1812_v19, 0.0 }
 0x6a3   :  { %1817 = vst [vmem:[#allocation13] sm:$0xff] %v1813_v61  ;;  %1818 = vst [vmem:[#allocation13 + $0x8] sm:$0xff] %v1814_v63 }
 0x6a4   :  { %1819 = vst [vmem:[#allocation13 + $0x10] sm:$0xff] %v1815_v2  ;;  %1820 = vst [vmem:[#allocation13 + $0x18] sm:$0xff] %v1816_v3 }
 0x6a5   :  { %2676 = shalt.err (!%p2673_p1)
}
 0x6a6   :  { %1832 = dma.vmem_to_hbm [thread:$0]  %s1827_s4, 512, %s3385_s5, [#allocation6], %s2698_s7, %s2698_s7, %s2699_s8  }
 0x6a7   :  { %2691 = dma.done.wait [#allocation6], 512  }
 0x6a8   :  { %2692 = vsyncadd [#allocation6], 4294966784 }
 0x6a9   :  { %1836 = vsyncpa [#allocation5], 1 }
 0x6aa   :  { %1837 = vsyncpa [#allocation8], 1 }
 0x6ab   :  { %1838 = vsyncpa [#allocation11], 1 }
 0x6ac   :  { %1839 = vsyncpa [#allocation6], 1 }

</bundles_post_ra>
